<compile_context>
chip_gen: v5e
topology: v5e:2x2
jax: 0.10.0
libtpu: 0.0.40
codegen_flags: <defaults>
</compile_context>

<pallas_src>
import functools
import math

import jax
import jax.numpy as jnp
from jax import lax
from jax.experimental import pallas as pl
from jax.experimental.pallas import tpu as pltpu


def _ffn_kernel(x_ref, g_ref, b_ref, w1_ref, b1_ref, w2_ref, b2_ref, o_ref, *,
                eps, approximate_gelu):
    # ---- LayerNorm over last dim (f32 math, matches PyTorch default) ----
    x = x_ref[...].astype(jnp.float32)
    mu = jnp.mean(x, axis=-1, keepdims=True)
    var = jnp.mean((x - mu) ** 2, axis=-1, keepdims=True)
    xn = (x - mu) * lax.rsqrt(var + eps)
    xn = xn * g_ref[...].astype(jnp.float32) + b_ref[...].astype(jnp.float32)

    # ---- Linear 1 (dim -> hidden): weights in native dtype straight to the MXU ----
    w1 = w1_ref[...]
    lhs1 = xn if w1.dtype == jnp.float32 else xn.astype(w1.dtype)
    h = jnp.dot(lhs1, w1, preferred_element_type=jnp.float32)
    h = h + b1_ref[...].astype(jnp.float32)

    # ---- GELU ----
    if approximate_gelu:
        # tanh form -> EUP slot (cheaper on the VPU-weak chips), opt-in only.
        h = jax.nn.gelu(h, approximate=True)
    else:
        # exact erf form; matches torch.nn.GELU() default.
        h = 0.5 * h * (1.0 + lax.erf(h * (1.0 / math.sqrt(2.0))))

    # Dropout(p=0.0) is the identity in both train and eval -> no-op.

    # ---- Linear 2 (hidden -> dim) ----
    w2 = w2_ref[...]
    lhs2 = h if w2.dtype == jnp.float32 else h.astype(w2.dtype)
    out = jnp.dot(lhs2, w2, preferred_element_type=jnp.float32)
    out = out + b2_ref[...].astype(jnp.float32)

    o_ref[...] = out.astype(o_ref.dtype)


def _round_up(a, b):
    return (a + b - 1) // b * b


def feed_forward(x, gamma, beta, w1, b1, w2, b2, *, eps=1e-5, tm=256,
                 approximate_gelu=False, vmem_limit_bytes=64 * 1024 * 1024):
    """x: (batch, seq, dim). Params:
       gamma, beta: (dim,)            LayerNorm affine
       w1: (dim, hidden), b1: (hidden,)   first Linear (stored input-major: y = x @ w1)
       w2: (hidden, dim), b2: (dim,)      second Linear
       Weights may be bf16 (recommended on v6e/v7x); biases/LN params any float dtype.
    """
    batch, seq, dim = x.shape
    hidden = w1.shape[1]
    M = batch * seq

    # Row tile: as large as `tm`, but no larger than the (sublane-rounded) row count.
    tm_eff = max(8, _round_up(min(tm, _round_up(M, 8)), 8))
    M_pad = _round_up(M, tm_eff)

    x2 = x.reshape(M, dim)
    if M_pad != M:
        x2 = jnp.pad(x2, ((0, M_pad - M), (0, 0)))

    g2 = gamma.reshape(1, dim)
    be2 = beta.reshape(1, dim)
    b1_2 = b1.reshape(1, hidden)
    b2_2 = b2.reshape(1, dim)

    out_itemsize = jnp.dtype(x.dtype).itemsize
    bytes_accessed = int(
        x2.size * x2.dtype.itemsize
        + w1.size * w1.dtype.itemsize
        + w2.size * w2.dtype.itemsize
        + (hidden + 3 * dim) * 4
        + M_pad * dim * out_itemsize
    )
    cost = pl.CostEstimate(
        flops=int(2 * M_pad * dim * hidden * 2),       # two GEMMs
        transcendentals=int(M_pad * hidden),           # erf/tanh per hidden activation
        bytes_accessed=bytes_accessed,
    )

    kernel = functools.partial(_ffn_kernel, eps=eps,
                               approximate_gelu=approximate_gelu)

    out = pl.pallas_call(
        kernel,
        out_shape=jax.ShapeDtypeStruct((M_pad, dim), x.dtype),
        grid_spec=pltpu.PrefetchScalarGridSpec(
            num_scalar_prefetch=0,
            grid=(M_pad // tm_eff,),
            in_specs=[
                pl.BlockSpec((tm_eff, dim), lambda i: (i, 0)),    # x row tile
                pl.BlockSpec((1, dim), lambda i: (0, 0)),         # gamma
                pl.BlockSpec((1, dim), lambda i: (0, 0)),         # beta
                pl.BlockSpec((dim, hidden), lambda i: (0, 0)),    # w1 (weight-stationary)
                pl.BlockSpec((1, hidden), lambda i: (0, 0)),      # b1
                pl.BlockSpec((hidden, dim), lambda i: (0, 0)),    # w2 (weight-stationary)
                pl.BlockSpec((1, dim), lambda i: (0, 0)),         # b2
            ],
            out_specs=pl.BlockSpec((tm_eff, dim), lambda i: (i, 0)),
        ),
        compiler_params=pltpu.CompilerParams(
            dimension_semantics=("parallel",),
            vmem_limit_bytes=vmem_limit_bytes,
        ),
        cost_estimate=cost,
    )(x2, g2, be2, w1, b1_2, w2, b2_2)

    if M_pad != M:
        out = out[:M]
    return out.reshape(batch, seq, dim)


def feed_forward_ref(x, gamma, beta, w1, b1, w2, b2, eps=1e-5):
    xf = x.astype(jnp.float32)
    mu = jnp.mean(xf, axis=-1, keepdims=True)
    var = jnp.mean((xf - mu) ** 2, axis=-1, keepdims=True)
    xn = (xf - mu) * lax.rsqrt(var + eps) * gamma + beta
    h = xn @ w1.astype(jnp.float32) + b1
    h = 0.5 * h * (1.0 + lax.erf(h / math.sqrt(2.0)))
    return (h @ w2.astype(jnp.float32) + b2).astype(x.dtype)


if __name__ == "__main__":
    key = jax.random.PRNGKey(0)
    # Small shapes; dim kept a multiple of 128 (lane-dense output), seq chosen so the
    # row count exercises the tail-padding path (M = 20 -> padded to 24).
    batch, seq, dim, mult = 2, 10, 128, 4
    hidden = dim * mult

    ks = jax.random.split(key, 6)
    x = jax.random.normal(ks[0], (batch, seq, dim), dtype=jnp.float32)

    # LayerNorm default init: gamma=1, beta=0 (use slight perturbation to exercise affine)
    gamma = jnp.ones((dim,), jnp.float32) + 0.01 * jax.random.normal(ks[5], (dim,), jnp.float32)
    beta = 0.01 * jax.random.normal(ks[4], (dim,), jnp.float32)
    # Linear weights stored as (in, out) so the kernel does x @ W
    w1 = jax.random.normal(ks[1], (dim, hidden), dtype=jnp.float32) * (1.0 / math.sqrt(dim))
    b1 = jax.random.normal(ks[2], (hidden,), dtype=jnp.float32) * 0.01
    w2 = jax.random.normal(ks[3], (hidden, dim), dtype=jnp.float32) * (1.0 / math.sqrt(hidden))
    b2 = jax.random.normal(ks[4], (dim,), dtype=jnp.float32) * 0.01

    ref = feed_forward_ref(x, gamma, beta, w1, b1, w2, b2)

    # f32-weight path (exact-erf GELU, matches PyTorch nn.GELU default)
    out = feed_forward(x, gamma, beta, w1, b1, w2, b2)
    out = jax.block_until_ready(out)
    assert out.shape == (batch, seq, dim)
    assert jnp.allclose(out, ref, atol=1e-3, rtol=1e-3), "f32 mismatch vs reference"

    # bf16-weight path (recommended on v6e/v7x): weights + matmul activations in bf16,
    # f32 accumulation; looser tolerance.
    out_bf16 = feed_forward(x, gamma, beta,
                            w1.astype(jnp.bfloat16), b1,
                            w2.astype(jnp.bfloat16), b2)
    out_bf16 = jax.block_until_ready(out_bf16)
    assert jnp.allclose(out_bf16, ref, atol=5e-2, rtol=5e-2), "bf16 mismatch vs reference"

    print("KERNEL_OK")
</pallas_src>

<mosaic_0001>
module attributes {stable_mosaic.version = 11 : i64} {
  func.func @_ffn_kernel(%arg0: i32, %arg1: memref<24x128xf32, #tpu.memory_space<vmem>>, %arg2: memref<1x128xf32, #tpu.memory_space<vmem>>, %arg3: memref<1x128xf32, #tpu.memory_space<vmem>>, %arg4: memref<128x512xf32, #tpu.memory_space<vmem>>, %arg5: memref<1x512xf32, #tpu.memory_space<vmem>>, %arg6: memref<512x128xf32, #tpu.memory_space<vmem>>, %arg7: memref<1x128xf32, #tpu.memory_space<vmem>>, %arg8: memref<24x128xf32, #tpu.memory_space<vmem>>) attributes {dimension_semantics = [#tpu.dimension_semantics<parallel>], iteration_bounds = array<i64: 1>, scalar_prefetch = 0 : i64, scratch_operands = 0 : i64, tpu.core_type = #tpu.core_type<tc>, window_params = [{transform_indices = @transform_0, window_bounds = array<i64: 24, 128>}, {pipeline_mode = #tpu.pipeline_mode<synchronous>, transform_indices = @transform_1, window_bounds = array<i64: 1, 128>}, {pipeline_mode = #tpu.pipeline_mode<synchronous>, transform_indices = @transform_2, window_bounds = array<i64: 1, 128>}, {pipeline_mode = #tpu.pipeline_mode<synchronous>, transform_indices = @transform_3, window_bounds = array<i64: 128, 512>}, {pipeline_mode = #tpu.pipeline_mode<synchronous>, transform_indices = @transform_4, window_bounds = array<i64: 1, 512>}, {pipeline_mode = #tpu.pipeline_mode<synchronous>, transform_indices = @transform_5, window_bounds = array<i64: 512, 128>}, {pipeline_mode = #tpu.pipeline_mode<synchronous>, transform_indices = @transform_6, window_bounds = array<i64: 1, 128>}, {transform_indices = @transform_7, window_bounds = array<i64: 24, 128>}]} {
    %c0 = arith.constant 0 : index
    %c0_0 = arith.constant 0 : index
    %0 = vector.load %arg1[%c0, %c0_0] : memref<24x128xf32, #tpu.memory_space<vmem>>, vector<24x128xf32>
    %cst = arith.constant dense<0.000000e+00> : vector<24xf32>
    %1 = vector.multi_reduction <add>, %0, %cst [1] : vector<24x128xf32> to vector<24xf32>
    %2 = vector.shape_cast %1 : vector<24xf32> to vector<24x1xf32>
    %cst_1 = arith.constant 1.280000e+02 : f32
    %3 = vector.broadcast %cst_1 : f32 to vector<24x1xf32>
    %4 = arith.divf %2, %3 : vector<24x1xf32>
    %5 = vector.broadcast %4 : vector<24x1xf32> to vector<24x128xf32>
    %6 = arith.subf %0, %5 : vector<24x128xf32>
    %7 = arith.mulf %6, %6 : vector<24x128xf32>
    %cst_2 = arith.constant dense<0.000000e+00> : vector<24xf32>
    %8 = vector.multi_reduction <add>, %7, %cst_2 [1] : vector<24x128xf32> to vector<24xf32>
    %9 = vector.shape_cast %8 : vector<24xf32> to vector<24x1xf32>
    %cst_3 = arith.constant 1.280000e+02 : f32
    %10 = vector.broadcast %cst_3 : f32 to vector<24x1xf32>
    %11 = arith.divf %9, %10 : vector<24x1xf32>
    %12 = vector.broadcast %4 : vector<24x1xf32> to vector<24x128xf32>
    %13 = arith.subf %0, %12 : vector<24x128xf32>
    %cst_4 = arith.constant 9.99999974E-6 : f32
    %14 = vector.broadcast %cst_4 : f32 to vector<24x1xf32>
    %15 = arith.addf %11, %14 : vector<24x1xf32>
    %16 = math.rsqrt %15 : vector<24x1xf32>
    %17 = vector.broadcast %16 : vector<24x1xf32> to vector<24x128xf32>
    %18 = arith.mulf %13, %17 : vector<24x128xf32>
    %c0_5 = arith.constant 0 : index
    %c0_6 = arith.constant 0 : index
    %19 = vector.load %arg2[%c0_5, %c0_6] : memref<1x128xf32, #tpu.memory_space<vmem>>, vector<1x128xf32>
    %20 = vector.broadcast %19 : vector<1x128xf32> to vector<24x128xf32>
    %21 = arith.mulf %18, %20 : vector<24x128xf32>
    %c0_7 = arith.constant 0 : index
    %c0_8 = arith.constant 0 : index
    %22 = vector.load %arg3[%c0_7, %c0_8] : memref<1x128xf32, #tpu.memory_space<vmem>>, vector<1x128xf32>
    %23 = vector.broadcast %22 : vector<1x128xf32> to vector<24x128xf32>
    %24 = arith.addf %21, %23 : vector<24x128xf32>
    %c0_9 = arith.constant 0 : index
    %c0_10 = arith.constant 0 : index
    %25 = vector.load %arg4[%c0_9, %c0_10] : memref<128x512xf32, #tpu.memory_space<vmem>>, vector<128x512xf32>
    %cst_11 = arith.constant dense<0.000000e+00> : vector<24x512xf32>
    %26 = tpu.matmul %24, %25, %cst_11 {dimension_numbers = #tpu.dot_dimension_numbers<[1], [0], [0], [1], [0, 0, 1, 1], [], []>} : vector<24x128xf32>, vector<128x512xf32>, vector<24x512xf32> -> vector<24x512xf32>
    %c0_12 = arith.constant 0 : index
    %c0_13 = arith.constant 0 : index
    %27 = vector.load %arg5[%c0_12, %c0_13] : memref<1x512xf32, #tpu.memory_space<vmem>>, vector<1x512xf32>
    %28 = vector.broadcast %27 : vector<1x512xf32> to vector<24x512xf32>
    %29 = arith.addf %26, %28 : vector<24x512xf32>
    %cst_14 = arith.constant 5.000000e-01 : f32
    %30 = vector.broadcast %cst_14 : f32 to vector<24x512xf32>
    %31 = arith.mulf %30, %29 : vector<24x512xf32>
    %cst_15 = arith.constant 0.707106769 : f32
    %32 = vector.broadcast %cst_15 : f32 to vector<24x512xf32>
    %33 = arith.mulf %29, %32 : vector<24x512xf32>
    %34 = math.erf %33 : vector<24x512xf32>
    %cst_16 = arith.constant 1.000000e+00 : f32
    %35 = vector.broadcast %cst_16 : f32 to vector<24x512xf32>
    %36 = arith.addf %35, %34 : vector<24x512xf32>
    %37 = arith.mulf %31, %36 : vector<24x512xf32>
    %c0_17 = arith.constant 0 : index
    %c0_18 = arith.constant 0 : index
    %38 = vector.load %arg6[%c0_17, %c0_18] : memref<512x128xf32, #tpu.memory_space<vmem>>, vector<512x128xf32>
    %cst_19 = arith.constant dense<0.000000e+00> : vector<24x128xf32>
    %39 = tpu.matmul %37, %38, %cst_19 {dimension_numbers = #tpu.dot_dimension_numbers<[1], [0], [0], [1], [0, 0, 1, 1], [], []>} : vector<24x512xf32>, vector<512x128xf32>, vector<24x128xf32> -> vector<24x128xf32>
    %c0_20 = arith.constant 0 : index
    %c0_21 = arith.constant 0 : index
    %40 = vector.load %arg7[%c0_20, %c0_21] : memref<1x128xf32, #tpu.memory_space<vmem>>, vector<1x128xf32>
    %41 = vector.broadcast %40 : vector<1x128xf32> to vector<24x128xf32>
    %42 = arith.addf %39, %41 : vector<24x128xf32>
    %c0_22 = arith.constant 0 : index
    %c0_23 = arith.constant 0 : index
    %43 = vector.load %arg8[%c0_22, %c0_23] : memref<24x128xf32, #tpu.memory_space<vmem>>, vector<24x128xf32>
    tpu.vector_store %arg8[%c0_22, %c0_23], %42 {strides = array<i32>} : memref<24x128xf32, #tpu.memory_space<vmem>>, vector<24x128xf32>,
    return
  }
  func.func @transform_0(%arg0: i32) -> (i32, i32) {
    %c0_i32 = arith.constant 0 : i32
    %c0_i32_0 = arith.constant 0 : i32
    return %arg0, %c0_i32 : i32, i32
  }
  func.func @transform_1(%arg0: i32) -> (i32, i32) {
    %c0_i32 = arith.constant 0 : i32
    %c0_i32_0 = arith.constant 0 : i32
    %c0_i32_1 = arith.constant 0 : i32
    return %c0_i32, %c0_i32_0 : i32, i32
  }
  func.func @transform_2(%arg0: i32) -> (i32, i32) {
    %c0_i32 = arith.constant 0 : i32
    %c0_i32_0 = arith.constant 0 : i32
    %c0_i32_1 = arith.constant 0 : i32
    return %c0_i32, %c0_i32_0 : i32, i32
  }
  func.func @transform_3(%arg0: i32) -> (i32, i32) {
    %c0_i32 = arith.constant 0 : i32
    %c0_i32_0 = arith.constant 0 : i32
    %c0_i32_1 = arith.constant 0 : i32
    return %c0_i32, %c0_i32_0 : i32, i32
  }
  func.func @transform_4(%arg0: i32) -> (i32, i32) {
    %c0_i32 = arith.constant 0 : i32
    %c0_i32_0 = arith.constant 0 : i32
    %c0_i32_1 = arith.constant 0 : i32
    return %c0_i32, %c0_i32_0 : i32, i32
  }
  func.func @transform_5(%arg0: i32) -> (i32, i32) {
    %c0_i32 = arith.constant 0 : i32
    %c0_i32_0 = arith.constant 0 : i32
    %c0_i32_1 = arith.constant 0 : i32
    return %c0_i32, %c0_i32_0 : i32, i32
  }
  func.func @transform_6(%arg0: i32) -> (i32, i32) {
    %c0_i32 = arith.constant 0 : i32
    %c0_i32_0 = arith.constant 0 : i32
    %c0_i32_1 = arith.constant 0 : i32
    return %c0_i32, %c0_i32_0 : i32, i32
  }
  func.func @transform_7(%arg0: i32) -> (i32, i32) {
    %c0_i32 = arith.constant 0 : i32
    %c0_i32_0 = arith.constant 0 : i32
    return %arg0, %c0_i32 : i32, i32
  }
}

</mosaic_0001>

<bundles_post_ra>
// kernel: tpu_custom_call.1
= control target key start
LH: loop header
LB: loop body
LE: loop exit
PB: predicated region body
PF: predicated region fallthrough
CT: control target
= control target key end

     0   :  { %12 = vsyncpa [#allocation3], 0  ;;  %s1974_s0 = inlined_call_operand.hbm [shape: f32[24,128], index: 0, kind: input, shape index: {}]   ;;  %s1975_s1 = inlined_call_operand.hbm [shape: f32[1,128], index: 1, kind: input, shape index: {}]   ;;  %s1976_s2 = inlined_call_operand.vmem [shape: f32[1,128], index: 2, kind: input, shape index: {}]   ;;  %s1977_s3 = inlined_call_operand.hbm [shape: f32[128,512], index: 3, kind: input, shape index: {}]   ;;  %s1978_s4 = inlined_call_operand.hbm [shape: f32[1,512], index: 4, kind: input, shape index: {}]   ;;  %s1979_s5 = inlined_call_operand.hbm [shape: f32[512,128], index: 5, kind: input, shape index: {}]   ;;  %s1980_s6 = inlined_call_operand.vmem [shape: f32[1,128], index: 6, kind: input, shape index: {}]   ;;  %s1981_s7 = inlined_call_operand.hbm [shape: f32[24,128], index: 7, kind: output, shape index: {}]  }
   0x1   :  { %13 = vsyncpa [#allocation6], 0 }
   0x2   :  { %14 = vsyncpa [#allocation9], 0  ;;  %s34_s26 = sshll.u32 %s1975_s1, 4  ;;  %s35_s26 = int_to_ptr.hbm [resolvable:$true] %s34_s26 }
   0x3   :  { %15 = vsyncpa [#allocation4], 0  ;;  %s1297_s27 = smov [#allocation5]   ;;  %s60_s8 = sshll.u32 %s1978_s4, 4  ;;  %s61_s8 = int_to_ptr.hbm [resolvable:$true] %s60_s8 }
   0x4   :  { %s36_s28 = sshll.u32 %s1297_s27, 4  ;;  %s1298_s9 = smov [#allocation8]   ;;  %s37_s28 = int_to_ptr.vmem [resolvable:$true] %s36_s28 }
   0x5   :  { %39 = dma.hbm_to_vmem [thread:$0]  %s35_s26, 16, %s37_s28, [#allocation6]  }
   0x6   :  { %s62_s10 = sshll.u32 %s1298_s9, 4  ;;  %s20_s13 = sshll.u32 %s1974_s0, 4  ;;  %s63_s10 = int_to_ptr.vmem [resolvable:$true] %s62_s10  ;;  %s21_s13 = int_to_ptr.hbm [resolvable:$true] %s20_s13 }
   0x7   :  { %65 = dma.hbm_to_vmem [thread:$0]  %s61_s8, 64, %s63_s10, [#allocation9]  }
   0x8   :  { %s1299_s1 = smov [#allocation2]   ;;  %s46_s17 = sshll.u32 %s1977_s3, 4  ;;  %s47_s17 = int_to_ptr.hbm [resolvable:$true] %s46_s17 }
   0x9   :  { %s22_s14 = sshll.u32 %s1299_s1, 4  ;;  %s1300_s18 = smov 128   ;;  %s23_s14 = int_to_ptr.vmem [resolvable:$true] %s22_s14 }
   0xa   :  { %s1301_s4 = smov 8   ;;  %s1302_s19 = smov [#allocation7]  }
   0xb   :  { %28 = dma.hbm_to_vmem [thread:$0]  %s21_s13, 384, %s23_s14, [#allocation3], %s1300_s18, %s1300_s18, %s1301_s4  }
   0xc   :  { %s48_s20 = sshll.u32 %s1302_s19, 4  ;;  %s1303_s0 = smov 512   ;;  %s49_s20 = int_to_ptr.vmem [resolvable:$true] %s48_s20 }
   0xd   :  { %s1304_s21 = smov 32   ;;  %s70_s24 = sshll.u32 %s1979_s5, 4  ;;  %s71_s24 = int_to_ptr.hbm [resolvable:$true] %s70_s24 }
   0xe   :  { %54 = dma.hbm_to_vmem [thread:$0]  %s47_s17, 8192, %s49_s20, [#allocation6], %s1303_s0, %s1303_s0, %s1304_s21  }
   0xf   :  { %s1305_s25 = smov [#allocation10]  }
  0x10   :  { %s72_s3 = sshll.u32 %s1305_s25, 4  ;;  %s73_s3 = int_to_ptr.vmem [resolvable:$true] %s72_s3 }
  0x11   :  { %78 = dma.hbm_to_vmem [thread:$0]  %s71_s24, 8192, %s73_s3, [#allocation9], %s1300_s18, %s1300_s18, %s1301_s4  }
  0x12   :  { %1289 = dma.done.wait [#allocation3], 384  }
  0x13   :  { %1290 = vsyncadd [#allocation3], 4294966912 }
  0x14   :  { %1291 = dma.done.wait [#allocation6], 8208  }
  0x15   :  { %1292 = vsyncadd [#allocation6], 4294959088 }
  0x16   :  { %1293 = dma.done.wait [#allocation9], 8256  }
  0x17   :  { %1294 = vsyncadd [#allocation9], 4294959040  ;;  %v101_v0 = vld [vmem:[#allocation2] sm:$0xff]  ;;  %v103_v1 = vld [vmem:[#allocation2 + $0x10] sm:$0xff]  ;;  %v1306_v3 = vmov 128.0   ;;  %s1072_s8 = sshll.u32 %s1981_s7, 4  ;;  %s1073_s8 = int_to_ptr.hbm [resolvable:$true] %s1072_s8 }
  0x18   :  { %104 = vadd.xlane.f32.xlu0 %v101_v0  ;;  %108 = vadd.xlane.f32.xlu1 %v103_v1  ;;  %v102_v2 = vld [vmem:[#allocation2 + $0x8] sm:$0xff]  ;;  %1113 = vrcp.f32 %v1306_v3  ;;  %v245_v8 = vld [vmem:[#allocation7 + $0x1e0] sm:$0xff]  ;;  %v248_v11 = vld [vmem:[#allocation7 + $0x1f8] sm:$0xff] }
  0x19   :  { %v246_v9 = vld [vmem:[#allocation7 + $0x1e8] sm:$0xff]  ;;  %v247_v10 = vld [vmem:[#allocation7 + $0x1f0] sm:$0xff]  ;;  %259 = vmatpush.msra.mxu0 %v245_v8  ;;  %v241_v12 = vld [vmem:[#allocation7 + $0x1c0] sm:$0xff]  ;;  %337 = vmatpush.msra.mxu3 %v248_v11 }
  0x1a   :  { %285 = vmatpush.msra.mxu1 %v246_v9  ;;  %v242_v13 = vld [vmem:[#allocation7 + $0x1c8] sm:$0xff]  ;;  %311 = vmatpush.msra.mxu2 %v247_v10  ;;  %v243_v14 = vld [vmem:[#allocation7 + $0x1d0] sm:$0xff]  ;;  %v244_v15 = vld [vmem:[#allocation7 + $0x1d8] sm:$0xff] }
  0x1b   :  { %260 = vmatpush.msra.mxu0 %v241_v12  ;;  %338 = vmatpush.msra.mxu3 %v244_v15  ;;  %v237_v30 = vld [vmem:[#allocation7 + $0x1a0] sm:$0xff]  ;;  %v238_v31 = vld [vmem:[#allocation7 + $0x1a8] sm:$0xff]  ;;  %v239_v32 = vld [vmem:[#allocation7 + $0x1b0] sm:$0xff] }
  0x1c   :  { %286 = vmatpush.msra.mxu1 %v242_v13  ;;  %312 = vmatpush.msra.mxu2 %v243_v14  ;;  %v240_v33 = vld [vmem:[#allocation7 + $0x1b8] sm:$0xff]  ;;  %v233_v34 = vld [vmem:[#allocation7 + $0x180] sm:$0xff]  ;;  %v234_v35 = vld [vmem:[#allocation7 + $0x188] sm:$0xff] }
  0x1d   :  { %261 = vmatpush.msra.mxu0 %v237_v30  ;;  %339 = vmatpush.msra.mxu3 %v240_v33  ;;  %v235_v36 = vld [vmem:[#allocation7 + $0x190] sm:$0xff]  ;;  %v236_v37 = vld [vmem:[#allocation7 + $0x198] sm:$0xff]  ;;  %v229_v38 = vld [vmem:[#allocation7 + $0x160] sm:$0xff] }
  0x1e   :  { %v1114_v4 = vpop.eup %1113  ;;  %287 = vmatpush.msra.mxu1 %v238_v31  ;;  %313 = vmatpush.msra.mxu2 %v239_v32  ;;  %v230_v39 = vld [vmem:[#allocation7 + $0x168] sm:$0xff]  ;;  %v231_v40 = vld [vmem:[#allocation7 + $0x170] sm:$0xff]  ;;  %v232_v41 = vld [vmem:[#allocation7 + $0x178] sm:$0xff] }
  0x1f   :  { %v111_v5 = vmul.f32 128.0, %v1114_v4  ;;  %vm115_vm0 = vweird.f32 %v1114_v4  ;;  %262 = vmatpush.msra.mxu0 %v233_v34  ;;  %340 = vmatpush.msra.mxu3 %v236_v37  ;;  %v225_v42 = vld [vmem:[#allocation7 + $0x140] sm:$0xff]  ;;  %v226_v43 = vld [vmem:[#allocation7 + $0x148] sm:$0xff]  ;;  %v227_v44 = vld [vmem:[#allocation7 + $0x150] sm:$0xff] }
  0x20   :  { %106 = vadd.xlane.f32.xlu0 %v102_v2  ;;  %288 = vmatpush.msra.mxu1 %v234_v35  ;;  %v228_v45 = vld [vmem:[#allocation7 + $0x158] sm:$0xff]  ;;  %v221_v46 = vld [vmem:[#allocation7 + $0x120] sm:$0xff]  ;;  %v222_v47 = vld [vmem:[#allocation7 + $0x128] sm:$0xff] }
  0x21   :  { %v112_v6 = vsub.f32 1.0, %v111_v5  ;;  %314 = vmatpush.msra.mxu2 %v235_v36  ;;  %263 = vmatpush.msra.mxu0 %v229_v38  ;;  %v223_v48 = vld [vmem:[#allocation7 + $0x130] sm:$0xff]  ;;  %v224_v49 = vld [vmem:[#allocation7 + $0x138] sm:$0xff]  ;;  %v217_v50 = vld [vmem:[#allocation7 + $0x100] sm:$0xff] }
  0x22   :  { %289 = vmatpush.msra.mxu1 %v230_v39  ;;  %341 = vmatpush.msra.mxu3 %v232_v41  ;;  %v218_v51 = vld [vmem:[#allocation7 + $0x108] sm:$0xff]  ;;  %v219_v52 = vld [vmem:[#allocation7 + $0x110] sm:$0xff]  ;;  %v220_v53 = vld [vmem:[#allocation7 + $0x118] sm:$0xff] }
  0x23   :  { %v113_v7 = vmul.f32 %v1114_v4, %v112_v6  ;;  %315 = vmatpush.msra.mxu2 %v231_v40  ;;  %264 = vmatpush.msra.mxu0 %v225_v42  ;;  %v213_v54 = vld [vmem:[#allocation7 + $0xe0] sm:$0xff]  ;;  %v214_v55 = vld [vmem:[#allocation7 + $0xe8] sm:$0xff]  ;;  %v215_v56 = vld [vmem:[#allocation7 + $0xf0] sm:$0xff] }
  0x24   :  { %290 = vmatpush.msra.mxu1 %v226_v43  ;;  %342 = vmatpush.msra.mxu3 %v228_v45  ;;  %v216_v57 = vld [vmem:[#allocation7 + $0xf8] sm:$0xff]  ;;  %v209_v58 = vld [vmem:[#allocation7 + $0xc0] sm:$0xff]  ;;  %v210_v59 = vld [vmem:[#allocation7 + $0xc8] sm:$0xff] }
  0x25   :  { %v114_v16 = vadd.f32 %v1114_v4, %v113_v7  ;;  %316 = vmatpush.msra.mxu2 %v227_v44  ;;  %265 = vmatpush.msra.mxu0 %v221_v46  ;;  %v211_v60 = vld [vmem:[#allocation7 + $0xd0] sm:$0xff]  ;;  %v212_v61 = vld [vmem:[#allocation7 + $0xd8] sm:$0xff]  ;;  %v205_v62 = vld [vmem:[#allocation7 + $0xa0] sm:$0xff] }
  0x26   :  { %291 = vmatpush.msra.mxu1 %v222_v47  ;;  %343 = vmatpush.msra.mxu3 %v224_v49  ;;  %v206_v63 = vld [vmem:[#allocation7 + $0xa8] sm:$0xff]  ;;  %v204_v5 = vld [vmem:[#allocation7 + $0x98] sm:$0xff]  ;;  %v197_v6 = vld [vmem:[#allocation7 + $0x60] sm:$0xff] }
  0x27   :  { %v1369_v17 = vsel %vm115_vm0, %v1114_v4, %v114_v16  ;;  %317 = vmatpush.msra.mxu2 %v223_v48  ;;  %266 = vmatpush.msra.mxu0 %v217_v50  ;;  %v202_v3 = vld [vmem:[#allocation7 + $0x88] sm:$0xff]  ;;  %v203_v4 = vld [vmem:[#allocation7 + $0x90] sm:$0xff]  ;;  %v200_v9 = vld [vmem:[#allocation7 + $0x78] sm:$0xff] }
  0x28   :  { %292 = vmatpush.msra.mxu1 %v218_v51  ;;  %344 = vmatpush.msra.mxu3 %v220_v53  ;;  %v198_v7 = vld [vmem:[#allocation7 + $0x68] sm:$0xff]  ;;  %v199_v8 = vld [vmem:[#allocation7 + $0x70] sm:$0xff]  ;;  %v193_v10 = vld [vmem:[#allocation7 + $0x40] sm:$0xff] }
  0x29   :  { %318 = vmatpush.msra.mxu2 %v219_v52  ;;  %267 = vmatpush.msra.mxu0 %v213_v54  ;;  %v194_v11 = vld [vmem:[#allocation7 + $0x48] sm:$0xff]  ;;  %v195_v12 = vld [vmem:[#allocation7 + $0x50] sm:$0xff]  ;;  %v196_v13 = vld [vmem:[#allocation7 + $0x58] sm:$0xff] }
  0x2a   :  { %293 = vmatpush.msra.mxu1 %v214_v55  ;;  %345 = vmatpush.msra.mxu3 %v216_v57  ;;  %v189_v14 = vld [vmem:[#allocation7 + $0x20] sm:$0xff]  ;;  %v190_v15 = vld [vmem:[#allocation7 + $0x28] sm:$0xff]  ;;  %v191_v16 = vld [vmem:[#allocation7 + $0x30] sm:$0xff] }
  0x2b   :  { %319 = vmatpush.msra.mxu2 %v215_v56  ;;  %268 = vmatpush.msra.mxu0 %v209_v58  ;;  %v1110_v43 = vld [vmem:[#allocation5] ss:$0 sm:$0xff]  ;;  %v1111_v47 = vld [vmem:[%s1976_s2] ss:$0 sm:$0xff] }
  0x2c   :  { %294 = vmatpush.msra.mxu1 %v210_v59  ;;  %346 = vmatpush.msra.mxu3 %v212_v61 }
  0x2d   :  { %320 = vmatpush.msra.mxu2 %v211_v60  ;;  %269 = vmatpush.msra.mxu0 %v205_v62 }
  0x2e   :  { %295 = vmatpush.msra.mxu1 %v206_v63 }
  0x30   :  { %296 = vmatpush.msra.mxu1 %v202_v3 }
  0x32   :  { %297 = vmatpush.msra.mxu1 %v198_v7 }
  0x34   :  { %298 = vmatpush.msra.mxu1 %v194_v11 }
  0x36   :  { %299 = vmatpush.msra.mxu1 %v190_v15 }
  0x8b   :  { %v105_v18 = vpop.xlane.xlu0 %104  ;;  %v109_v23 = vpop.xlane.xlu1 %108 }
  0x8c   :  { %v117_v19 = vmul.f32 %v1369_v17, %v105_v18  ;;  %v119_v26 = vmul.f32 %v1369_v17, %v109_v23  ;;  %v192_v18 = vld [vmem:[#allocation7 + $0x38] sm:$0xff] }
  0x8d   :  { %v188_v23 = vld [vmem:[#allocation7 + $0x18] sm:$0xff] }
  0x8e   :  { %v1372_v20 = vsub.f32 %v101_v0, %v117_v19  ;;  %v1382_v28 = vsub.f32 %v103_v1, %v119_v26  ;;  %v207_v0 = vld [vmem:[#allocation7 + $0xb0] sm:$0xff]  ;;  %v208_v1 = vld [vmem:[#allocation7 + $0xb8] sm:$0xff]  ;;  %v185_v19 = vld [vmem:[#allocation7] sm:$0xff] }
  0x8f   :  { %321 = vmatpush.msra.mxu2 %v207_v0  ;;  %347 = vmatpush.msra.mxu3 %v208_v1 }
  0x90   :  { %v123_v21 = vmul.f32 %v1372_v20, %v1372_v20  ;;  %v125_v29 = vmul.f32 %v1382_v28, %v1382_v28 }
  0x91   :  { %322 = vmatpush.msra.mxu2 %v203_v4  ;;  %348 = vmatpush.msra.mxu3 %v204_v5 }
  0x92   :  { %126 = vadd.xlane.f32.xlu1 %v123_v21  ;;  %v186_v21 = vld [vmem:[#allocation7 + $0x8] sm:$0xff] }
  0x93   :  { %v107_v22 = vpop.xlane.xlu0 %106  ;;  %323 = vmatpush.msra.mxu2 %v199_v8  ;;  %349 = vmatpush.msra.mxu3 %v200_v9 }
  0x94   :  { %v118_v24 = vmul.f32 %v1369_v17, %v107_v22  ;;  %v187_v22 = vld [vmem:[#allocation7 + $0x10] sm:$0xff]  ;;  %300 = vmatpush.msra.mxu1 %v186_v21 }
  0x95   :  { %324 = vmatpush.msra.mxu2 %v195_v12  ;;  %350 = vmatpush.msra.mxu3 %v196_v13 }
  0x96   :  { %v1377_v25 = vsub.f32 %v102_v2, %v118_v24  ;;  %v201_v2 = vld [vmem:[#allocation7 + $0x80] sm:$0xff] }
  0x97   :  { %270 = vmatpush.msra.mxu0 %v201_v2  ;;  %325 = vmatpush.msra.mxu2 %v191_v16 }
  0x98   :  { %v124_v27 = vmul.f32 %v1377_v25, %v1377_v25  ;;  %351 = vmatpush.msra.mxu3 %v192_v18 }
  0x99   :  { %271 = vmatpush.msra.mxu0 %v197_v6  ;;  %326 = vmatpush.msra.mxu2 %v187_v22 }
  0x9a   :  { %128 = vadd.xlane.f32.xlu2 %v124_v27  ;;  %352 = vmatpush.msra.mxu3 %v188_v23 }
  0x9b   :  { %272 = vmatpush.msra.mxu0 %v193_v10 }
  0x9d   :  { %273 = vmatpush.msra.mxu0 %v189_v14 }
  0x9f   :  { %274 = vmatpush.msra.mxu0 %v185_v19 }
  0xa2   :  { %130 = vadd.xlane.f32.xlu2 %v125_v29 }
 0x105   :  { %v127_v24 = vpop.xlane.xlu1 %126 }
 0x106   :  { %v132_v26 = vmul.f32 %v127_v24, %v1369_v17 }
 0x108   :  { %v135_v27 = vadd.f32 1e-05, %v132_v26 }
 0x10a   :  { %1115 = vrsqrt.f32 %v135_v27  ;;  %vm144_vm2 = vweird.f32 %v135_v27 }
 0x10d   :  { %v129_v29 = vpop.xlane.xlu2 %128 }
 0x10e   :  { %v133_v30 = vmul.f32 %v129_v29, %v1369_v17 }
 0x110   :  { %v1116_v31 = vpop.eup %1115  ;;  %v136_v32 = vadd.f32 1e-05, %v133_v30 }
 0x111   :  { %v139_v33 = vmul.f32 %v1116_v31, %v135_v27  ;;  %vm145_vm1 = vweird.f32 %v1116_v31 }
 0x112   :  { %1117 = vrsqrt.f32 %v136_v32  ;;  %vm146_vm3 = vmor %vm144_vm2, %vm145_vm1  ;;  %vm154_vm5 = vweird.f32 %v136_v32 }
 0x113   :  { %v140_v34 = vmul.f32 %v1116_v31, %v139_v33 }
 0x115   :  { %v141_v35 = vmul.f32 0.5, %v140_v34  ;;  %v131_v36 = vpop.xlane.xlu2 %130 }
 0x116   :  { %v134_v37 = vmul.f32 %v131_v36, %v1369_v17 }
 0x117   :  { %v142_v38 = vsub.f32 1.5, %v141_v35 }
 0x118   :  { %v1118_v39 = vpop.eup %1117  ;;  %v137_v40 = vadd.f32 1e-05, %v134_v37 }
 0x119   :  { %v143_v41 = vmul.f32 %v1116_v31, %v142_v38  ;;  %v149_v42 = vmul.f32 %v1118_v39, %v136_v32  ;;  %vm155_vm4 = vweird.f32 %v1118_v39 }
 0x11a   :  { %1119 = vrsqrt.f32 %v137_v40  ;;  %vm156_vm6 = vmor %vm154_vm5, %vm155_vm4  ;;  %vm164_vm8 = vweird.f32 %v137_v40 }
 0x11b   :  { %v147_v44 = vsel %vm146_vm3, %v1116_v31, %v143_v41  ;;  %v150_v45 = vmul.f32 %v1118_v39, %v149_v42 }
 0x11c   :  { %v168_v46 = vmul.f32 %v147_v44, %v1372_v20 }
 0x11d   :  { %v151_v48 = vmul.f32 0.5, %v150_v45 }
 0x11e   :  { %v175_v17 = vmul.f32 %v1110_v43, %v168_v46 }
 0x11f   :  { %v152_v49 = vsub.f32 1.5, %v151_v48 }
 0x120   :  { %v1120_v50 = vpop.eup %1119  ;;  %v182_v51 = vadd.f32 %v1111_v47, %v175_v17 }
 0x121   :  { %v153_v52 = vmul.f32 %v1118_v39, %v152_v49  ;;  %v159_v53 = vmul.f32 %v1120_v50, %v137_v40  ;;  %vm165_vm7 = vweird.f32 %v1120_v50 }
 0x122   :  { %275 = vmatmul.f32.vlgmr.msra.gmra.mxu0 %v182_v51  ;;  %301 = vmatmul.f32.vlgmr.msra.gmra.mxu1 %v182_v51  ;;  %vm166_vm9 = vmor %vm164_vm8, %vm165_vm7 }
 0x123   :  { %v157_v54 = vsel %vm156_vm6, %v1118_v39, %v153_v52  ;;  %v160_v55 = vmul.f32 %v1120_v50, %v159_v53  ;;  %327 = vmatmul.f32.vlgmr.msra.gmra.mxu2 %v182_v51  ;;  %353 = vmatmul.f32.vlgmr.msra.gmra.mxu3 %v182_v51 }
 0x124   :  { %v169_v20 = vmul.f32 %v157_v54, %v1377_v25  ;;  %v249_v25 = vld [vmem:[#allocation8] sm:$0xf] }
 0x125   :  { %v161_v56 = vmul.f32 0.5, %v160_v55  ;;  %v1395_v1 = vperm.slane %v249_v25, 0  ;;  %v1397_v2 = vperm.slane %v249_v25, 1  ;;  %v1411_v8 = vperm.slane %v249_v25, 2 }
 0x126   :  { %v176_v57 = vmul.f32 %v1110_v43, %v169_v20  ;;  %v1413_v9 = vperm.slane %v249_v25, 3 }
 0x127   :  { %v162_v58 = vsub.f32 1.5, %v161_v56 }
 0x128   :  { %v183_v59 = vadd.f32 %v1111_v47, %v176_v57 }
 0x129   :  { %v163_v60 = vmul.f32 %v1120_v50, %v162_v58 }
 0x12a   :  { %278 = vmatmul.f32.gmra.mxu0 %v183_v59  ;;  %304 = vmatmul.f32.gmra.mxu1 %v183_v59 }
 0x12b   :  { %v167_v61 = vsel %vm166_vm9, %v1120_v50, %v163_v60  ;;  %330 = vmatmul.f32.gmra.mxu2 %v183_v59  ;;  %356 = vmatmul.f32.gmra.mxu3 %v183_v59 }
 0x12c   :  { %v170_v62 = vmul.f32 %v167_v61, %v1382_v28 }
 0x12e   :  { %v177_v63 = vmul.f32 %v1110_v43, %v170_v62 }
 0x130   :  { %v184_v0 = vadd.f32 %v1111_v47, %v177_v63 }
 0x132   :  { %281 = vmatmul.f32.gmra.mxu0 %v184_v0  ;;  %307 = vmatmul.f32.gmra.mxu1 %v184_v0 }
 0x133   :  { %333 = vmatmul.f32.gmra.mxu2 %v184_v0  ;;  %359 = vmatmul.f32.gmra.mxu3 %v184_v0 }
 0x19f   :  { %v276_v3 = vpop.f32.mrf.mxu0  ;;  %v302_v4 = vpop.f32.mrf.mxu1 }
 0x1a0   :  { %v1400_v5 = vadd.f32 %v276_v3, %v1395_v1  ;;  %v1403_v6 = vadd.f32 %v302_v4, %v1397_v2 }
 0x1a2   :  { %v1406_v28 = vmul.f32 0.70710677, %v1400_v5  ;;  %v1409_v7 = vmul.f32 0.70710677, %v1403_v6 }
 0x1a4   :  { %v387_v10 = vmul.f32 %v1406_v28, %v1406_v28  ;;  %v427_v11 = vmul.f32 %v1409_v7, %v1409_v7 }
 0x1a6   :  { %v1419_v12 = vmin.f32 %v387_v10, 16.0  ;;  %v1421_v13 = vmin.f32 %v427_v11, 16.0  ;;  %v328_v14 = vpop.f32.mrf.mxu2  ;;  %v354_v15 = vpop.f32.mrf.mxu3 }
 0x1a7   :  { %v1424_v16 = vadd.f32 %v328_v14, %v1411_v8  ;;  %v1427_v18 = vadd.f32 %v354_v15, %v1413_v9  ;;  %v279_v51 = vpop.f32.mrf.mxu0 }
 0x1a8   :  { %v389_v19 = vmul.f32 2.1237322e-06, %v1419_v12  ;;  %v400_v21 = vmul.f32 3.8918573e-05, %v1419_v12  ;;  %v429_v22 = vmul.f32 2.1237322e-06, %v1421_v13  ;;  %v1462_v59 = vadd.f32 %v279_v51, %v1395_v1 }
 0x1a9   :  { %v440_v23 = vmul.f32 3.8918573e-05, %v1421_v13  ;;  %v1434_v24 = vmul.f32 0.70710677, %v1424_v16  ;;  %v1439_v32 = vmul.f32 0.70710677, %v1427_v18 }
 0x1aa   :  { %v390_v26 = vadd.f32 0.00028619796, %v389_v19  ;;  %v401_v27 = vadd.f32 0.001143296, %v400_v21  ;;  %v430_v29 = vadd.f32 0.00028619796, %v429_v22 }
 0x1ab   :  { %v441_v30 = vadd.f32 0.001143296, %v440_v23  ;;  %v467_v31 = vmul.f32 %v1434_v24, %v1434_v24  ;;  %v507_v38 = vmul.f32 %v1439_v32, %v1439_v32  ;;  %v1472_v19 = vmul.f32 0.70710677, %v1462_v59 }
 0x1ac   :  { %v391_v33 = vmul.f32 %v390_v26, %v1419_v12  ;;  %v402_v34 = vmul.f32 %v401_v27, %v1419_v12  ;;  %v431_v35 = vmul.f32 %v430_v29, %v1421_v13 }
 0x1ad   :  { %v442_v36 = vmul.f32 %v441_v30, %v1421_v13  ;;  %v1445_v37 = vmin.f32 %v467_v31, 16.0  ;;  %v1454_v48 = vmin.f32 %v507_v38, 16.0 }
 0x1ae   :  { %v392_v39 = vadd.f32 0.0036580483, %v391_v33  ;;  %v403_v40 = vadd.f32 0.014752088, %v402_v34  ;;  %v432_v41 = vadd.f32 0.0036580483, %v431_v35  ;;  %v547_v35 = vmul.f32 %v1472_v19, %v1472_v19 }
 0x1af   :  { %v443_v42 = vadd.f32 0.014752088, %v442_v36  ;;  %v469_v43 = vmul.f32 2.1237322e-06, %v1445_v37  ;;  %v480_v44 = vmul.f32 3.8918573e-05, %v1445_v37  ;;  %v305_v36 = vpop.f32.mrf.mxu1 }
 0x1b0   :  { %v393_v45 = vmul.f32 %v392_v39, %v1419_v12  ;;  %v404_v46 = vmul.f32 %v403_v40, %v1419_v12  ;;  %v433_v47 = vmul.f32 %v432_v41, %v1421_v13  ;;  %v509_v56 = vmul.f32 2.1237322e-06, %v1454_v48  ;;  %v331_v41 = vpop.f32.mrf.mxu2 }
 0x1b1   :  { %v444_v17 = vmul.f32 %v443_v42, %v1421_v13  ;;  %v470_v49 = vadd.f32 0.00028619796, %v469_v43  ;;  %v481_v50 = vadd.f32 0.001143296, %v480_v44  ;;  %v520_v58 = vmul.f32 3.8918573e-05, %v1454_v48 }
 0x1b2   :  { %v394_v52 = vadd.f32 0.05243302, %v393_v45  ;;  %v405_v53 = vadd.f32 0.112945676, %v404_v46  ;;  %v434_v54 = vadd.f32 0.05243302, %v433_v47  ;;  %v1490_v44 = vadd.f32 %v305_v36, %v1397_v2 }
 0x1b3   :  { %v445_v55 = vadd.f32 0.112945676, %v444_v17  ;;  %v482_v20 = vmul.f32 %v481_v50, %v1445_v37  ;;  %v471_v61 = vmul.f32 %v470_v49, %v1445_v37  ;;  %v510_v63 = vadd.f32 0.00028619796, %v509_v56  ;;  %v906_v17 = vld [vmem:[#allocation10 + $0x78] sm:$0xff] }
 0x1b4   :  { %v406_v57 = vmul.f32 %v405_v53, %v1419_v12  ;;  %v395_v0 = vmul.f32 %v394_v52, %v1419_v12  ;;  %v435_v3 = vmul.f32 %v434_v54, %v1421_v13  ;;  %v521_v15 = vadd.f32 0.001143296, %v520_v58  ;;  %v922_v49 = vld [vmem:[#allocation10 + $0xf8] sm:$0xff]  ;;  %v357_v52 = vpop.f32.mrf.mxu3  ;;  %959 = vmatpush.msrb.mxu0 %v906_v17  ;;  %v905_v53 = vld [vmem:[#allocation10 + $0x70] sm:$0xff]  ;;  %v904_v58 = vld [vmem:[#allocation10 + $0x68] sm:$0xff] }
 0x1b5   :  { %v446_v60 = vmul.f32 %v445_v55, %v1421_v13  ;;  %v483_v62 = vadd.f32 0.014752088, %v482_v20  ;;  %v511_v11 = vmul.f32 %v510_v63, %v1454_v48  ;;  %v472_v22 = vadd.f32 0.0036580483, %v471_v61  ;;  %985 = vmatpush.msrb.mxu1 %v922_v49  ;;  %v918_v36 = vld [vmem:[#allocation10 + $0xd8] sm:$0xff]  ;;  %v901_v17 = vld [vmem:[#allocation10 + $0x50] sm:$0xff] }
 0x1b6   :  { %v407_v25 = vadd.f32 0.4994258, %v406_v57  ;;  %v396_v26 = vadd.f32 0.18741608, %v395_v0  ;;  %v436_v29 = vadd.f32 0.18741608, %v435_v3  ;;  %v522_v34 = vmul.f32 %v521_v15, %v1454_v48  ;;  %v282_v57 = vpop.f32.mrf.mxu0  ;;  %960 = vmatpush.msrb.mxu0 %v905_v53 }
 0x1b7   :  { %v447_v4 = vadd.f32 0.4994258, %v446_v60  ;;  %v484_v10 = vmul.f32 %v483_v62, %v1445_v37  ;;  %v512_v33 = vadd.f32 0.0036580483, %v511_v11  ;;  %v473_v38 = vmul.f32 %v472_v22, %v1445_v37  ;;  %v903_v11 = vld [vmem:[#allocation10 + $0x60] sm:$0xff]  ;;  %v936_v53 = vld [vmem:[#allocation10 + $0x168] sm:$0xff] }
 0x1b8   :  { %v408_v14 = vmul.f32 %v407_v25, %v1419_v12  ;;  %v397_v39 = vmul.f32 %v396_v26, %v1419_v12  ;;  %v437_v40 = vmul.f32 %v436_v29, %v1421_v13  ;;  %v1493_v45 = vmul.f32 0.5, %v1400_v5  ;;  %v921_v5 = vld [vmem:[#allocation10 + $0xf0] sm:$0xff]  ;;  %v920_v25 = vld [vmem:[#allocation10 + $0xe8] sm:$0xff]  ;;  %961 = vmatpush.msrb.mxu0 %v904_v58  ;;  %v954_v26 = vld [vmem:[#allocation10 + $0x1f8] sm:$0xff] }
 0x1b9   :  { %v448_v21 = vmul.f32 %v447_v4, %v1421_v13  ;;  %v485_v23 = vadd.f32 0.112945676, %v484_v10  ;;  %v513_v43 = vmul.f32 %v512_v33, %v1454_v48  ;;  %v523_v46 = vadd.f32 0.014752088, %v522_v34  ;;  %986 = vmatpush.msrb.mxu1 %v921_v5  ;;  %1037 = vmatpush.msrb.mxu3 %v954_v26  ;;  %v952_v5 = vld [vmem:[#allocation10 + $0x1e8] sm:$0xff]  ;;  %v899_v26 = vld [vmem:[#allocation10 + $0x40] sm:$0xff] }
 0x1ba   :  { %v1475_v27 = vadd.f32 1.0, %v408_v14  ;;  %v1495_v47 = vmin.f32 %v547_v35, 16.0  ;;  %v1498_v50 = vmul.f32 0.5, %v1403_v6  ;;  %v474_v12 = vadd.f32 0.05243302, %v473_v38  ;;  %v919_v14 = vld [vmem:[#allocation10 + $0xe0] sm:$0xff]  ;;  %962 = vmatpush.msrb.mxu0 %v903_v11 }
 0x1bb   :  { %v1477_v30 = vadd.f32 1.0, %v448_v21  ;;  %v486_v31 = vmul.f32 %v485_v23, %v1445_v37  ;;  %v1502_v51 = vadd.f32 %v331_v41, %v1411_v8  ;;  %v398_v55 = vadd.f32 1.1283791, %v397_v39  ;;  %987 = vmatpush.msrb.mxu1 %v920_v25  ;;  %v938_v23 = vld [vmem:[#allocation10 + $0x178] sm:$0xff]  ;;  %v937_v38 = vld [vmem:[#allocation10 + $0x170] sm:$0xff]  ;;  %v916_v58 = vld [vmem:[#allocation10 + $0xc8] sm:$0xff] }
 0x1bc   :  { %1121 = vrcp.f32 %v1475_v27  ;;  %v438_v20 = vadd.f32 1.1283791, %v437_v40  ;;  %v1507_v56 = vmul.f32 0.5, %v1424_v16  ;;  %v524_v6 = vmul.f32 %v523_v46, %v1454_v48  ;;  %1011 = vmatpush.msrb.mxu2 %v938_v23  ;;  %v902_v35 = vld [vmem:[#allocation10 + $0x58] sm:$0xff]  ;;  %v953_v40 = vld [vmem:[#allocation10 + $0x1f0] sm:$0xff] }
 0x1bd   :  { %1123 = vrcp.f32 %v1477_v30  ;;  %v487_v42 = vadd.f32 0.4994258, %v486_v31  ;;  %v514_v63 = vadd.f32 0.05243302, %v513_v43  ;;  %v1517_v0 = vmul.f32 0.70710677, %v1490_v44  ;;  %988 = vmatpush.msrb.mxu1 %v919_v14  ;;  %1038 = vmatpush.msrb.mxu3 %v953_v40 }
 0x1be   :  { %v525_v3 = vadd.f32 0.112945676, %v524_v6  ;;  %v549_v4 = vmul.f32 2.1237322e-06, %v1495_v47  ;;  %v1525_v10 = vadd.f32 %v357_v52, %v1413_v9  ;;  %v1529_v21 = vmul.f32 0.70710677, %v1502_v51  ;;  %1012 = vmatpush.msrb.mxu2 %v937_v38  ;;  %963 = vmatpush.msrb.mxu0 %v902_v35 }
 0x1bf   :  { %v488_v13 = vmul.f32 %v487_v42, %v1445_v37  ;;  %v1532_v22 = vadd.f32 %v282_v57, %v1395_v1  ;;  %v1535_v29 = vmul.f32 %v398_v55, %v1406_v28  ;;  %v419_v31 = vand.u32 2147483647, %v1475_v27  ;;  %989 = vmatpush.msrb.mxu1 %v918_v36  ;;  %v917_v52 = vld [vmem:[#allocation10 + $0xd0] sm:$0xff]  ;;  %1039 = vmatpush.msrb.mxu3 %v952_v5  ;;  %v900_v57 = vld [vmem:[#allocation10 + $0x48] sm:$0xff]  ;;  %v947_v55 = vld [vmem:[#allocation10 + $0x1c0] sm:$0xff] }
 0x1c0   :  { %v475_v33 = vmul.f32 %v474_v12, %v1445_v37  ;;  %v526_v34 = vmul.f32 %v525_v3, %v1454_v48  ;;  %vm415_vm10 = vweird.f32 %v1475_v27  ;;  %v421_v1 = vand.u32 2147483648, %v1475_v27  ;;  %1013 = vmatpush.msrb.mxu2 %v936_v53  ;;  %964 = vmatpush.msrb.mxu0 %v901_v17  ;;  %v898_v17 = vld [vmem:[#allocation10 + $0x38] sm:$0xff] }
 0x1c1   :  { %v1514_v62 = vadd.f32 1.0, %v488_v13  ;;  %v1543_v39 = vmul.f32 %v438_v20, %v1409_v7  ;;  %v587_v28 = vmul.f32 %v1517_v0, %v1517_v0  ;;  %v459_v43 = vand.u32 2147483647, %v1477_v30  ;;  %990 = vmatpush.msrb.mxu1 %v917_v52 }
 0x1c2   :  { %v1504_v54 = vpop.eup %1121  ;;  %v527_v46 = vadd.f32 0.4994258, %v526_v34  ;;  %v515_v49 = vmul.f32 %v514_v63, %v1454_v48  ;;  %v550_v7 = vadd.f32 0.00028619796, %v549_v4  ;;  %v627_v13 = vmul.f32 %v1529_v21, %v1529_v21  ;;  %v951_v4 = vld [vmem:[#allocation10 + $0x1e0] sm:$0xff]  ;;  %965 = vmatpush.msrb.mxu0 %v900_v57  ;;  %v913_v57 = vld [vmem:[#allocation10 + $0xb0] sm:$0xff] }
 0x1c3   :  { %v1510_v60 = vpop.eup %1123  ;;  %v411_v61 = vmul.f32 %v1504_v54, %v1475_v27  ;;  %1125 = vrcp.f32 %v1514_v62  ;;  %v1551_v12 = vmin.f32 %v587_v28, 16.0  ;;  %vm1555_vm11 = vcmp.eq.f32.partialorder %v419_v31, 8.507059e+37  ;;  %1040 = vmatpush.msrb.mxu3 %v951_v4  ;;  %v915_v31 = vld [vmem:[#allocation10 + $0xc0] sm:$0xff]  ;;  %991 = vmatpush.msrb.mxu1 %v916_v58  ;;  %v914_v27 = vld [vmem:[#allocation10 + $0xb8] sm:$0xff]  ;;  %v893_v28 = vld [vmem:[#allocation10 + $0x10] sm:$0xff] }
 0x1c4   :  { %v1521_v16 = vmul.f32 %v1510_v60, %v1477_v30  ;;  %vm455_vm12 = vweird.f32 %v1477_v30  ;;  %v476_v20 = vadd.f32 0.18741608, %v475_v33  ;;  %v528_v6 = vmul.f32 %v527_v46, %v1454_v48  ;;  %v934_v33 = vld [vmem:[#allocation10 + $0x158] sm:$0xff]  ;;  %966 = vmatpush.msrb.mxu0 %v899_v26 }
 0x1c5   :  { %v412_v15 = vsub.f32 1.0, %v411_v61  ;;  %v935_v61 = vld [vmem:[#allocation10 + $0x160] sm:$0xff]  ;;  %vm416_vm13 = vweird.f32 %v1504_v54  ;;  %v461_v25 = vand.u32 2147483648, %v1477_v30  ;;  %v1566_v3 = vmin.f32 %v627_v13, 16.0  ;;  %992 = vmatpush.msrb.mxu1 %v915_v31  ;;  %v933_v13 = vld [vmem:[#allocation10 + $0x150] sm:$0xff] }
 0x1c6   :  { %v452_v42 = vsub.f32 1.0, %v1521_v16  ;;  %v589_v16 = vmul.f32 2.1237322e-06, %v1551_v12  ;;  %v422_v14 = vor.u32 1.1754944e-38, %v421_v1  ;;  %1014 = vmatpush.msrb.mxu2 %v935_v61  ;;  %v516_v34 = vadd.f32 0.18741608, %v515_v49  ;;  %vm1582_vm14 = vmor %vm415_vm10, %vm416_vm13  ;;  %967 = vmatpush.msrb.mxu0 %v898_v17 }
 0x1c7   :  { %v413_v41 = vmul.f32 %v1504_v54, %v412_v15  ;;  %v1572_v35 = vadd.f32 1.0, %v528_v6  ;;  %v551_v36 = vmul.f32 %v550_v7, %v1495_v47  ;;  %v1576_v38 = vmul.f32 0.70710677, %v1525_v10  ;;  %v950_v1 = vld [vmem:[#allocation10 + $0x1d8] sm:$0xff]  ;;  %v897_v6 = vld [vmem:[#allocation10 + $0x30] sm:$0xff]  ;;  %993 = vmatpush.msrb.mxu1 %v914_v27  ;;  %v895_v17 = vld [vmem:[#allocation10 + $0x20] sm:$0xff] }
 0x1c8   :  { %v453_v15 = vmul.f32 %v1510_v60, %v452_v42  ;;  %v477_v40 = vmul.f32 %v476_v20, %v1445_v37  ;;  %v590_v42 = vadd.f32 0.00028619796, %v589_v16  ;;  %v629_v46 = vmul.f32 2.1237322e-06, %v1566_v3  ;;  %1015 = vmatpush.msrb.mxu2 %v934_v33  ;;  %1041 = vmatpush.msrb.mxu3 %v950_v1  ;;  %v949_v37 = vld [vmem:[#allocation10 + $0x1d0] sm:$0xff]  ;;  %v896_v33 = vld [vmem:[#allocation10 + $0x28] sm:$0xff] }
 0x1c9   :  { %v1561_v63 = vpop.eup %1125  ;;  %v414_v11 = vadd.f32 %v1504_v54, %v413_v41  ;;  %vm456_vm15 = vweird.f32 %v1510_v60  ;;  %v499_v49 = vand.u32 2147483647, %v1514_v62  ;;  %v501_v7 = vand.u32 2147483648, %v1514_v62  ;;  %v931_v1 = vld [vmem:[#allocation10 + $0x140] sm:$0xff]  ;;  %968 = vmatpush.msrb.mxu0 %v897_v6  ;;  %994 = vmatpush.msrb.mxu1 %v913_v57  ;;  %v894_v57 = vld [vmem:[#allocation10 + $0x18] sm:$0xff] }
 0x1ca   :  { %v491_v23 = vmul.f32 %v1561_v63, %v1514_v62  ;;  %1127 = vrcp.f32 %v1572_v35  ;;  %v1596_v53 = vadd.f32 %v1510_v60, %v453_v15  ;;  %v591_v5 = vmul.f32 %v590_v42, %v1551_v12  ;;  %1016 = vmatpush.msrb.mxu2 %v933_v13  ;;  %1042 = vmatpush.msrb.mxu3 %v949_v37  ;;  %vm1623_vm2 = vmor %vm455_vm12, %vm456_vm15  ;;  %v908_v15 = vld [vmem:[#allocation10 + $0x88] sm:$0xff] }
 0x1cb   :  { %v418_v52 = vsel %vm1582_vm14, %v1504_v54, %v414_v11  ;;  %v630_v20 = vadd.f32 0.00028619796, %v629_v46  ;;  %v1599_v58 = vor.u32 1.1754944e-38, %v461_v25  ;;  %v552_v16 = vadd.f32 0.0036580483, %v551_v36  ;;  %v932_v54 = vld [vmem:[#allocation10 + $0x148] sm:$0xff]  ;;  %969 = vmatpush.msrb.mxu0 %v896_v33 }
 0x1cc   :  { %v492_v41 = vsub.f32 1.0, %v491_v23  ;;  %v667_v4 = vmul.f32 %v1576_v38, %v1576_v38  ;;  %v308_v23 = vpop.f32.mrf.mxu1  ;;  %v948_v11 = vld [vmem:[#allocation10 + $0x1c8] sm:$0xff]  ;;  %vm1606_vm0 = vcmp.eq.f32.partialorder %v459_v43, 8.507059e+37  ;;  %v1610_v26 = vadd.f32 1.1283791, %v477_v40  ;;  %1017 = vmatpush.msrb.mxu2 %v932_v54 }
 0x1cd   :  { %vm495_vm1 = vweird.f32 %v1514_v62  ;;  %v1614_v25 = vmul.f32 %v516_v34, %v1454_v48  ;;  %v631_v31 = vmul.f32 %v630_v20, %v1566_v3  ;;  %1043 = vmatpush.msrb.mxu3 %v948_v11  ;;  %v912_v36 = vld [vmem:[#allocation10 + $0xa8] sm:$0xff]  ;;  %v423_v43 = vsel %vm1555_vm11, %v422_v14, %v418_v52  ;;  %v946_v52 = vld [vmem:[#allocation10 + $0x1b8] sm:$0xff]  ;;  %970 = vmatpush.msrb.mxu0 %v895_v17 }
 0x1ce   :  { %v493_v61 = vmul.f32 %v1561_v63, %v492_v41  ;;  %v1627_v48 = vor.u32 1.1754944e-38, %v501_v7  ;;  %v1629_v34 = vmin.f32 %v667_v4, 16.0  ;;  %v1632_v40 = vmul.f32 0.70710677, %v1532_v22  ;;  %v334_v41 = vpop.f32.mrf.mxu2  ;;  %1018 = vmatpush.msrb.mxu2 %v931_v1  ;;  %v911_v7 = vld [vmem:[#allocation10 + $0xa0] sm:$0xff]  ;;  %995 = vmatpush.msrb.mxu1 %v912_v36 }
 0x1cf   :  { %v458_v30 = vsel %vm1623_vm2, %v1510_v60, %v1596_v53  ;;  %vm496_vm3 = vweird.f32 %v1561_v63  ;;  %vm1639_vm4 = vcmp.eq.f32.partialorder %v499_v49, 8.507059e+37  ;;  %v592_v42 = vadd.f32 0.0036580483, %v591_v5  ;;  %1044 = vmatpush.msrb.mxu3 %v947_v55  ;;  %971 = vmatpush.msrb.mxu0 %v894_v57 }
 0x1d0   :  { %v1644_v46 = vadd.f32 %v308_v23, %v1397_v2  ;;  %v1646_v27 = vpop.eup %1127  ;;  %v1649_v13 = vadd.f32 %v1561_v63, %v493_v61  ;;  %v553_v60 = vmul.f32 %v552_v16, %v1495_v47  ;;  %v669_v49 = vmul.f32 2.1237322e-06, %v1629_v34  ;;  %v930_v2 = vld [vmem:[#allocation10 + $0x138] sm:$0xff]  ;;  %v929_v16 = vld [vmem:[#allocation10 + $0x130] sm:$0xff]  ;;  %996 = vmatpush.msrb.mxu1 %v911_v7  ;;  %vm1671_vm6 = vmor %vm495_vm1, %vm496_vm3 }
 0x1d1   :  { %v707_v37 = vmul.f32 %v1632_v40, %v1632_v40  ;;  %v1656_v53 = vmul.f32 %v423_v43, %v1535_v29  ;;  %v531_v5 = vmul.f32 %v1646_v27, %v1572_v35  ;;  %v632_v20 = vadd.f32 0.0036580483, %v631_v31  ;;  %1019 = vmatpush.msrb.mxu2 %v930_v2  ;;  %1045 = vmatpush.msrb.mxu3 %v946_v52  ;;  %v910_v61 = vld [vmem:[#allocation10 + $0x98] sm:$0xff]  ;;  %v945_v29 = vld [vmem:[#allocation10 + $0x1b0] sm:$0xff] }
 0x1d2   :  { %v1661_v6 = vadd.f32 %v334_v41, %v1411_v8  ;;  %vm535_vm5 = vweird.f32 %v1572_v35  ;;  %v539_v4 = vand.u32 2147483647, %v1572_v35  ;;  %v670_v23 = vadd.f32 0.00028619796, %v669_v49  ;;  %997 = vmatpush.msrb.mxu1 %v910_v61  ;;  %v909_v41 = vld [vmem:[#allocation10 + $0x90] sm:$0xff]  ;;  %972 = vmatpush.msrb.mxu0 %v893_v28 }
 0x1d3   :  { %v1665_v54 = vmin.f32 %v707_v37, 16.0  ;;  %v532_v11 = vsub.f32 1.0, %v531_v5  ;;  %vm536_vm7 = vweird.f32 %v1646_v27  ;;  %v593_v31 = vmul.f32 %v592_v42, %v1551_v12  ;;  %1020 = vmatpush.msrb.mxu2 %v929_v16  ;;  %1046 = vmatpush.msrb.mxu3 %v945_v29  ;;  %v943_v16 = vld [vmem:[#allocation10 + $0x1a0] sm:$0xff]  ;;  %v924_v37 = vld [vmem:[#allocation10 + $0x108] sm:$0xff] }
 0x1d4   :  { %v1678_v33 = vmul.f32 0.70710677, %v1644_v46  ;;  %v498_v36 = vsel %vm1671_vm6, %v1561_v63, %v1649_v13  ;;  %v554_v62 = vadd.f32 0.05243302, %v553_v60  ;;  %v671_v1 = vmul.f32 %v670_v23, %v1629_v34  ;;  %v928_v63 = vld [vmem:[#allocation10 + $0x128] sm:$0xff]  ;;  %vm1700_vm8 = vmor %vm535_vm5, %vm536_vm7  ;;  %998 = vmatpush.msrb.mxu1 %v909_v41 }
 0x1d5   :  { %v709_v43 = vmul.f32 2.1237322e-06, %v1665_v54  ;;  %v533_v55 = vmul.f32 %v1646_v27, %v532_v11  ;;  %v633_v42 = vmul.f32 %v632_v20, %v1566_v3  ;;  %v1691_v7 = vmul.f32 0.70710677, %v1661_v6  ;;  %v944_v13 = vld [vmem:[#allocation10 + $0x1a8] sm:$0xff]  ;;  %1021 = vmatpush.msrb.mxu2 %v928_v63  ;;  %v925_v63 = vld [vmem:[#allocation10 + $0x110] sm:$0xff] }
 0x1d6   :  { %v747_v17 = vmul.f32 %v1678_v33, %v1678_v33  ;;  %v892_v60 = vld [vmem:[#allocation10 + $0x8] sm:$0xff]  ;;  %v463_v49 = vsel %vm1606_vm0, %v1599_v58, %v458_v30  ;;  %v541_v2 = vand.u32 2147483648, %v1572_v35  ;;  %v672_v52 = vadd.f32 0.0036580483, %v671_v1  ;;  %1047 = vmatpush.msrb.mxu3 %v944_v13  ;;  %v927_v30 = vld [vmem:[#allocation10 + $0x120] sm:$0xff]  ;;  %999 = vmatpush.msrb.mxu1 %v908_v15 }
 0x1d7   :  { %v710_v5 = vadd.f32 0.00028619796, %v709_v43  ;;  %v534_v20 = vadd.f32 %v1646_v27, %v533_v55  ;;  %v594_v57 = vadd.f32 0.05243302, %v593_v31  ;;  %v787_v58 = vmul.f32 %v1691_v7, %v1691_v7  ;;  %973 = vmatpush.msrb.mxu0 %v892_v60  ;;  %v891_v31 = vld [vmem:[#allocation10] sm:$0xff]  ;;  %v926_v43 = vld [vmem:[#allocation10 + $0x118] sm:$0xff]  ;;  %1022 = vmatpush.msrb.mxu2 %v927_v30 }
 0x1d8   :  { %v1706_v61 = vmin.f32 %v747_v17, 16.0  ;;  %v503_v23 = vsel %vm1639_vm4, %v1627_v48, %v498_v36  ;;  %v518_v29 = vadd.f32 1.1283791, %v1614_v25  ;;  %v555_v8 = vmul.f32 %v554_v62, %v1495_v47  ;;  %v907_v1 = vld [vmem:[#allocation10 + $0x80] sm:$0xff]  ;;  %1048 = vmatpush.msrb.mxu3 %v943_v16  ;;  %v942_v25 = vld [vmem:[#allocation10 + $0x198] sm:$0xff] }
 0x1d9   :  { %v711_v11 = vmul.f32 %v710_v5, %v1665_v54  ;;  %v538_v28 = vsel %vm1700_vm8, %v1646_v27, %v534_v20  ;;  %v634_v41 = vadd.f32 0.05243302, %v633_v42  ;;  %v673_v55 = vmul.f32 %v672_v52, %v1629_v34  ;;  %974 = vmatpush.msrb.mxu0 %v891_v31  ;;  %1000 = vmatpush.msrb.mxu1 %v907_v1  ;;  %v941_v27 = vld [vmem:[#allocation10 + $0x190] sm:$0xff]  ;;  %v939_v15 = vld [vmem:[#allocation10 + $0x180] sm:$0xff] }
 0x1da   :  { %v749_v48 = vmul.f32 2.1237322e-06, %v1706_v61  ;;  %v464_v14 = vmul.f32 %v463_v49, %v1543_v39  ;;  %v479_v36 = vmul.f32 %v1610_v26, %v1434_v24  ;;  %v542_v62 = vor.u32 1.1754944e-38, %v541_v2  ;;  %1023 = vmatpush.msrb.mxu2 %v926_v43  ;;  %1049 = vmatpush.msrb.mxu3 %v942_v25  ;;  %v940_v2 = vld [vmem:[#allocation10 + $0x188] sm:$0xff] }
 0x1db   :  { %v1724_v17 = vmin.f32 %v787_v58, 16.0  ;;  %v1727_v42 = vmul.f32 0.5, %v1427_v18  ;;  %vm540_vm9 = vcmp.eq.f32.partialorder %v539_v4, 8.507059e+37  ;;  %v595_v13 = vmul.f32 %v594_v57, %v1551_v12  ;;  %v360_v57 = vpop.f32.mrf.mxu3 }
 0x1dc   :  { %v712_v60 = vadd.f32 0.0036580483, %v711_v11  ;;  %v504_v39 = vmul.f32 %v503_v23, %v479_v36  ;;  %v519_v24 = vmul.f32 %v518_v29, %v1439_v32  ;;  %v543_v26 = vsel %vm540_vm9, %v542_v62, %v538_v28  ;;  %1024 = vmatpush.msrb.mxu2 %v925_v63  ;;  %1050 = vmatpush.msrb.mxu3 %v941_v27  ;;  %v923_v32 = vld [vmem:[#allocation10 + $0x100] sm:$0xff] }
 0x1dd   :  { %v750_v49 = vadd.f32 0.00028619796, %v749_v48  ;;  %v556_v52 = vadd.f32 0.18741608, %v555_v8  ;;  %v635_v5 = vmul.f32 %v634_v41, %v1566_v3  ;;  %v674_v18 = vadd.f32 0.05243302, %v673_v55 }
 0x1de   :  { %v1087_v20 = vclamps-f32 %v1656_v53, 1.0  ;;  %v1736_v35 = vmul.f32 0.5, %v1462_v59  ;;  %v789_v4 = vmul.f32 2.1237322e-06, %v1724_v17  ;;  %v1088_v58 = vclamps-f32 %v464_v14, 1.0  ;;  %1025 = vmatpush.msrb.mxu2 %v924_v37  ;;  %1051 = vmatpush.msrb.mxu3 %v940_v2 }
 0x1df   :  { %v544_v30 = vmul.f32 %v543_v26, %v519_v24  ;;  %v596_v16 = vadd.f32 0.18741608, %v595_v13  ;;  %v713_v23 = vmul.f32 %v712_v60, %v1665_v54  ;;  %v1741_v53 = vmul.f32 0.5, %v1490_v44 }
 0x1e0   :  { %v867_v29 = vadd.f32 1.0, %v1087_v20  ;;  %v751_v8 = vmul.f32 %v750_v49, %v1706_v61  ;;  %v868_v59 = vadd.f32 1.0, %v1088_v58  ;;  %v1089_v11 = vclamps-f32 %v504_v39, 1.0  ;;  %1026 = vmatpush.msrb.mxu2 %v923_v32  ;;  %1052 = vmatpush.msrb.mxu3 %v939_v15 }
 0x1e1   :  { %v636_v31 = vadd.f32 0.18741608, %v635_v5  ;;  %v675_v1 = vmul.f32 %v674_v18, %v1629_v34  ;;  %v1746_v43 = vadd.f32 %v360_v57, %v1413_v9  ;;  %v1750_v41 = vmul.f32 0.5, %v1502_v51 }
 0x1e2   :  { %v879_v28 = vmul.f32 %v867_v29, %v1493_v45  ;;  %v790_v55 = vadd.f32 0.00028619796, %v789_v4  ;;  %v880_v44 = vmul.f32 %v868_v59, %v1498_v50  ;;  %v869_v48 = vadd.f32 1.0, %v1089_v11 }
 0x1e3   :  { %v557_v25 = vmul.f32 %v556_v52, %v1495_v47  ;;  %v597_v14 = vmul.f32 %v596_v16, %v1551_v12  ;;  %v714_v36 = vadd.f32 0.05243302, %v713_v23  ;;  %v1090_v62 = vclamps-f32 %v544_v30, 1.0 }
 0x1e4   :  { %975 = vmatmul.f32.vlgmr.msrb.gmra.mxu0 %v879_v28  ;;  %v1756_v9 = vmul.f32 0.5, %v1525_v10  ;;  %v752_v45 = vadd.f32 0.0036580483, %v751_v8  ;;  %1001 = vmatmul.f32.vlgmr.msrb.gmra.mxu1 %v880_v44  ;;  %v881_v63 = vmul.f32 %v869_v48, %v1507_v56  ;;  %v560_v51 = vmul.f32 3.8918573e-05, %v1495_v47 }
 0x1e5   :  { %v637_v27 = vmul.f32 %v636_v31, %v1566_v3  ;;  %v676_v50 = vadd.f32 0.18741608, %v675_v1  ;;  %v1762_v13 = vmul.f32 0.70710677, %v1746_v43  ;;  %v870_v60 = vadd.f32 1.0, %v1090_v62 }
 0x1e6   :  { %v791_v39 = vmul.f32 %v790_v55, %v1724_v17  ;;  %1027 = vmatmul.f32.vlgmr.msrb.gmra.mxu2 %v881_v63  ;;  %v561_v24 = vadd.f32 0.001143296, %v560_v51  ;;  %v600_v10 = vmul.f32 3.8918573e-05, %v1551_v12  ;;  %v640_v26 = vmul.f32 3.8918573e-05, %v1566_v3 }
 0x1e7   :  { %v558_v49 = vadd.f32 1.1283791, %v557_v25  ;;  %v1767_v37 = vadd.f32 1.1283791, %v597_v14  ;;  %v715_v56 = vmul.f32 %v714_v36, %v1665_v54  ;;  %v882_v2 = vmul.f32 %v870_v60, %v1727_v42 }
 0x1e8   :  { %v753_v52 = vmul.f32 %v752_v45, %v1706_v61  ;;  %v562_v5 = vmul.f32 %v561_v24, %v1495_v47  ;;  %v601_v18 = vadd.f32 0.001143296, %v600_v10  ;;  %v641_v20 = vadd.f32 0.001143296, %v640_v26 }
 0x1e9   :  { %v1773_v4 = vadd.f32 1.1283791, %v637_v27  ;;  %v677_v57 = vmul.f32 %v676_v50, %v1629_v34  ;;  %v827_v58 = vmul.f32 %v1762_v13, %v1762_v13  ;;  %1053 = vmatmul.f32.vlgmr.msrb.gmra.mxu3 %v882_v2  ;;  %v680_v32 = vmul.f32 3.8918573e-05, %v1629_v34 }
 0x1ea   :  { %v792_v15 = vadd.f32 0.0036580483, %v791_v39  ;;  %v563_v30 = vadd.f32 0.014752088, %v562_v5  ;;  %v602_v42 = vmul.f32 %v601_v18, %v1551_v12  ;;  %v642_v16 = vmul.f32 %v641_v20, %v1566_v3 }
 0x1eb   :  { %v1782_v23 = vmul.f32 %v558_v49, %v1472_v19  ;;  %v716_v29 = vadd.f32 0.18741608, %v715_v56  ;;  %v681_v8 = vadd.f32 0.001143296, %v680_v32  ;;  %v720_v59 = vmul.f32 3.8918573e-05, %v1665_v54 }
 0x1ec   :  { %v754_v11 = vadd.f32 0.05243302, %v753_v52  ;;  %v564_v31 = vmul.f32 %v563_v30, %v1495_v47  ;;  %v603_v1 = vadd.f32 0.014752088, %v602_v42  ;;  %v643_v28 = vadd.f32 0.014752088, %v642_v16 }
 0x1ed   :  { %v678_v55 = vadd.f32 1.1283791, %v677_v57  ;;  %v1786_v44 = vmin.f32 %v827_v58, 16.0  ;;  %v682_v48 = vmul.f32 %v681_v8, %v1629_v34  ;;  %v721_v25 = vadd.f32 0.001143296, %v720_v59 }
 0x1ee   :  { %v793_v14 = vmul.f32 %v792_v15, %v1724_v17  ;;  %v565_v36 = vadd.f32 0.112945676, %v564_v31  ;;  %v604_v19 = vmul.f32 %v603_v1, %v1551_v12  ;;  %v644_v62 = vmul.f32 %v643_v28, %v1566_v3 }
 0x1ef   :  { %v717_v45 = vmul.f32 %v716_v29, %v1665_v54  ;;  %v683_v63 = vadd.f32 0.014752088, %v682_v48  ;;  %v722_v51 = vmul.f32 %v721_v25, %v1665_v54  ;;  %v760_v27 = vmul.f32 3.8918573e-05, %v1706_v61 }
 0x1f0   :  { %v755_v50 = vmul.f32 %v754_v11, %v1706_v61  ;;  %v566_v60 = vmul.f32 %v565_v36, %v1495_v47  ;;  %v605_v39 = vadd.f32 0.112945676, %v604_v19  ;;  %v645_v24 = vadd.f32 0.112945676, %v644_v62 }
 0x1f1   :  { %v684_v10 = vmul.f32 %v683_v63, %v1629_v34  ;;  %v723_v26 = vadd.f32 0.014752088, %v722_v51  ;;  %v761_v49 = vadd.f32 0.001143296, %v760_v27  ;;  %v800_v56 = vmul.f32 3.8918573e-05, %v1724_v17 }
 0x1f2   :  { %v794_v2 = vadd.f32 0.05243302, %v793_v14  ;;  %v567_v52 = vadd.f32 0.4994258, %v566_v60  ;;  %v606_v5 = vmul.f32 %v605_v39, %v1551_v12  ;;  %v646_v18 = vmul.f32 %v645_v24, %v1566_v3 }
 0x1f3   :  { %v685_v20 = vadd.f32 0.112945676, %v684_v10  ;;  %v724_v57 = vmul.f32 %v723_v26, %v1665_v54  ;;  %v762_v58 = vmul.f32 %v761_v49, %v1706_v61  ;;  %v801_v32 = vadd.f32 0.001143296, %v800_v56 }
 0x1f4   :  { %v756_v15 = vadd.f32 0.18741608, %v755_v50  ;;  %v568_v30 = vmul.f32 %v567_v52, %v1495_v47  ;;  %v607_v42 = vadd.f32 0.4994258, %v606_v5  ;;  %v647_v16 = vadd.f32 0.4994258, %v646_v18 }
 0x1f5   :  { %v686_v29 = vmul.f32 %v685_v20, %v1629_v34  ;;  %v725_v8 = vadd.f32 0.112945676, %v724_v57  ;;  %v763_v59 = vadd.f32 0.014752088, %v762_v58  ;;  %v802_v11 = vmul.f32 %v801_v32, %v1724_v17 }
 0x1f6   :  { %v829_v31 = vmul.f32 2.1237322e-06, %v1786_v44  ;;  %v1807_v1 = vadd.f32 1.0, %v568_v30  ;;  %v608_v28 = vmul.f32 %v607_v42, %v1551_v12  ;;  %v648_v48 = vmul.f32 %v647_v16, %v1566_v3 }
 0x1f7   :  { %v687_v25 = vadd.f32 0.4994258, %v686_v29  ;;  %v726_v14 = vmul.f32 %v725_v8, %v1665_v54  ;;  %v764_v47 = vmul.f32 %v763_v59, %v1706_v61  ;;  %v803_v36 = vadd.f32 0.014752088, %v802_v11 }
 0x1f8   :  { %v718_v19 = vadd.f32 1.1283791, %v717_v45  ;;  %v757_v62 = vmul.f32 %v756_v15, %v1706_v61  ;;  %v795_v63 = vmul.f32 %v794_v2, %v1724_v17  ;;  %1129 = vrcp.f32 %v1807_v1 }
 0x1f9   :  { %v1816_v51 = vadd.f32 1.0, %v608_v28  ;;  %v1818_v27 = vadd.f32 1.0, %v648_v48  ;;  %v688_v12 = vmul.f32 %v687_v25, %v1629_v34  ;;  %v727_v3 = vadd.f32 0.4994258, %v726_v14 }
 0x1fa   :  { %v1823_v50 = vmul.f32 %v1767_v37, %v1517_v0  ;;  %v1827_v45 = vmul.f32 %v1773_v4, %v1529_v21  ;;  %v765_v60 = vadd.f32 0.112945676, %v764_v47  ;;  %v804_v39 = vmul.f32 %v803_v36, %v1724_v17 }
 0x1fb   :  { %v1831_v24 = vmul.f32 %v678_v55, %v1576_v38  ;;  %v1833_v10 = vadd.f32 0.00028619796, %v829_v31  ;;  %v579_v26 = vand.u32 2147483647, %v1807_v1  ;;  %1131 = vrcp.f32 %v1816_v51 }
 0x1fc   :  { %v1838_v34 = vmul.f32 %v718_v19, %v1632_v40  ;;  %v1840_v0 = vadd.f32 0.18741608, %v795_v63  ;;  %v581_v21 = vand.u32 2147483648, %v1807_v1  ;;  %1133 = vrcp.f32 %v1818_v27 }
 0x1fd   :  { %v1844_v37 = vadd.f32 1.1283791, %v757_v62  ;;  %v621_v38 = vand.u32 2147483648, %v1816_v51  ;;  %v1847_v4 = vadd.f32 1.0, %v688_v12  ;;  %v728_v55 = vmul.f32 %v727_v3, %v1665_v54 }
 0x1fe   :  { %v1130_v49 = vpop.eup %1129  ;;  %vm575_vm10 = vweird.f32 %v1807_v1  ;;  %v619_v40 = vand.u32 2147483647, %v1816_v51  ;;  %v766_v56 = vmul.f32 %v765_v60, %v1706_v61  ;;  %v805_v2 = vadd.f32 0.112945676, %v804_v39 }
 0x1ff   :  { %v571_v52 = vmul.f32 %v1130_v49, %v1807_v1  ;;  %vm1854_vm11 = vcmp.eq.f32.partialorder %v579_v26, 8.507059e+37  ;;  %v659_v18 = vand.u32 2147483647, %v1818_v27  ;;  %1135 = vrcp.f32 %v1847_v4 }
 0x200   :  { %v582_v20 = vor.u32 1.1754944e-38, %v581_v21  ;;  %vm615_vm12 = vweird.f32 %v1816_v51  ;;  %v661_v54 = vand.u32 2147483648, %v1818_v27  ;;  %v1862_v57 = vadd.f32 1.0, %v728_v55 }
 0x201   :  { %v1132_v58 = vpop.eup %1131  ;;  %v572_v32 = vsub.f32 1.0, %v571_v52  ;;  %v622_v15 = vor.u32 1.1754944e-38, %v621_v38  ;;  %vm655_vm13 = vweird.f32 %v1818_v27  ;;  %v767_v30 = vadd.f32 0.4994258, %v766_v56 }
 0x202   :  { %v1134_v42 = vpop.eup %1133  ;;  %v611_v16 = vmul.f32 %v1132_v58, %v1816_v51  ;;  %vm1866_vm14 = vcmp.eq.f32.partialorder %v619_v40, 8.507059e+37  ;;  %v699_v8 = vand.u32 2147483647, %v1847_v4  ;;  %v701_v59 = vand.u32 2147483648, %v1847_v4 }
 0x203   :  { %v806_v11 = vmul.f32 %v805_v2, %v1724_v17  ;;  %v573_v31 = vmul.f32 %v1130_v49, %v572_v32  ;;  %vm576_vm15 = vweird.f32 %v1130_v49  ;;  %v651_v28 = vmul.f32 %v1134_v42, %v1818_v27 }
 0x204   :  { %vm1874_vm0 = vcmp.eq.f32.partialorder %v659_v18, 8.507059e+37  ;;  %1137 = vrcp.f32 %v1862_v57  ;;  %v612_v25 = vsub.f32 1.0, %v611_v16  ;;  %v662_v14 = vor.u32 1.1754944e-38, %v661_v54  ;;  %vm577_vm3 = vmor %vm575_vm10, %vm576_vm15 }
 0x205   :  { %vm695_vm1 = vweird.f32 %v1847_v4  ;;  %v1881_v47 = vmul.f32 3.8918573e-05, %v1786_v44  ;;  %v1136_v36 = vpop.eup %1135  ;;  %v574_v19 = vadd.f32 %v1130_v49, %v573_v31  ;;  %vm616_vm2 = vweird.f32 %v1132_v58 }
 0x206   :  { %v652_v62 = vsub.f32 1.0, %v651_v28  ;;  %v768_v63 = vmul.f32 %v767_v30, %v1706_v61  ;;  %v613_v12 = vmul.f32 %v1132_v58, %v612_v25  ;;  %v691_v3 = vmul.f32 %v1136_v36, %v1847_v4  ;;  %vm617_vm7 = vmor %vm615_vm12, %vm616_vm2 }
 0x207   :  { %vm1887_vm4 = vcmp.eq.f32.partialorder %v699_v8, 8.507059e+37  ;;  %v702_v39 = vor.u32 1.1754944e-38, %v701_v59  ;;  %v807_v26 = vadd.f32 0.4994258, %v806_v11  ;;  %v578_v21 = vsel %vm577_vm3, %v1130_v49, %v574_v19 }
 0x208   :  { %v653_v38 = vmul.f32 %v1134_v42, %v652_v62  ;;  %vm656_vm5 = vweird.f32 %v1134_v42  ;;  %v1891_v55 = vadd.f32 1.0, %v768_v63  ;;  %v583_v61 = vsel %vm1854_vm11, %v582_v20, %v578_v21 }
 0x209   :  { %v614_v40 = vadd.f32 %v1132_v58, %v613_v12  ;;  %v692_v1 = vsub.f32 1.0, %v691_v3  ;;  %vm735_vm6 = vweird.f32 %v1862_v57  ;;  %v584_v2 = vmul.f32 %v583_v61, %v1782_v23  ;;  %vm657_vm9 = vmor %vm655_vm13, %vm656_vm5 }
 0x20a   :  { %v1138_v56 = vpop.eup %1137  ;;  %v654_v52 = vadd.f32 %v1134_v42, %v653_v38  ;;  %vm696_vm8 = vweird.f32 %v1136_v36  ;;  %1139 = vrcp.f32 %v1891_v55  ;;  %v808_v20 = vmul.f32 %v807_v26, %v1724_v17 }
 0x20b   :  { %v618_v49 = vsel %vm617_vm7, %v1132_v58, %v614_v40  ;;  %v693_v5 = vmul.f32 %v1136_v36, %v692_v1  ;;  %v731_v18 = vmul.f32 %v1138_v56, %v1862_v57  ;;  %v1091_v54 = vclamps-f32 %v584_v2, 1.0  ;;  %vm697_vm10 = vmor %vm695_vm1, %vm696_vm8 }
 0x20c   :  { %v623_v23 = vsel %vm1866_vm14, %v622_v15, %v618_v49  ;;  %v658_v32 = vsel %vm657_vm9, %v1134_v42, %v654_v52  ;;  %v739_v51 = vand.u32 2147483647, %v1862_v57  ;;  %vm736_vm11 = vweird.f32 %v1138_v56 }
 0x20d   :  { %v624_v30 = vmul.f32 %v623_v23, %v1823_v50  ;;  %v663_v58 = vsel %vm1874_vm0, %v662_v14, %v658_v32  ;;  %v694_v16 = vadd.f32 %v1136_v36, %v693_v5  ;;  %v732_v27 = vsub.f32 1.0, %v731_v18  ;;  %vm737_vm13 = vmor %vm735_vm6, %vm736_vm11 }
 0x20e   :  { %v871_v8 = vadd.f32 1.0, %v1091_v54  ;;  %v664_v59 = vmul.f32 %v663_v58, %v1827_v45  ;;  %v741_v15 = vand.u32 2147483648, %v1862_v57  ;;  %v1916_v31 = vadd.f32 1.0, %v808_v20 }
 0x20f   :  { %v1092_v42 = vclamps-f32 %v624_v30, 1.0  ;;  %v698_v29 = vsel %vm697_vm10, %v1136_v36, %v694_v16  ;;  %v733_v11 = vmul.f32 %v1138_v56, %v732_v27  ;;  %vm1921_vm12 = vcmp.eq.f32.partialorder %v739_v51, 8.507059e+37 }
 0x210   :  { %v1140_v50 = vpop.eup %1139  ;;  %v883_v28 = vmul.f32 %v871_v8, %v1736_v35  ;;  %v1093_v48 = vclamps-f32 %v664_v59, 1.0  ;;  %v703_v25 = vsel %vm1887_vm4, %v702_v39, %v698_v29  ;;  %v742_v35 = vor.u32 1.1754944e-38, %v741_v15 }
 0x211   :  { %v872_v4 = vadd.f32 1.0, %v1092_v42  ;;  %v704_v14 = vmul.f32 %v703_v25, %v1831_v24  ;;  %v734_v19 = vadd.f32 %v1138_v56, %v733_v11  ;;  %v771_v36 = vmul.f32 %v1140_v50, %v1891_v55 }
 0x212   :  { %978 = vmatmul.f32.gmra.mxu0 %v883_v28  ;;  %v873_v62 = vadd.f32 1.0, %v1093_v48  ;;  %v779_v63 = vand.u32 2147483647, %v1891_v55  ;;  %1141 = vrcp.f32 %v1916_v31  ;;  %vm776_vm14 = vweird.f32 %v1140_v50 }
 0x213   :  { %v884_v12 = vmul.f32 %v872_v4, %v1741_v53  ;;  %v1094_v3 = vclamps-f32 %v704_v14, 1.0  ;;  %v738_v60 = vsel %vm737_vm13, %v1138_v56, %v734_v19  ;;  %v772_v39 = vsub.f32 1.0, %v771_v36 }
 0x214   :  { %v885_v24 = vmul.f32 %v873_v62, %v1750_v41  ;;  %v743_v26 = vsel %vm1921_vm12, %v742_v35, %v738_v60  ;;  %v781_v21 = vand.u32 2147483648, %v1891_v55  ;;  %v841_v40 = vadd.f32 0.001143296, %v1881_v47 }
 0x215   :  { %1004 = vmatmul.f32.gmra.mxu1 %v884_v12  ;;  %v874_v57 = vadd.f32 1.0, %v1094_v3  ;;  %v744_v38 = vmul.f32 %v743_v26, %v1838_v34  ;;  %v773_v61 = vmul.f32 %v1140_v50, %v772_v39  ;;  %v831_v53 = vmul.f32 %v1833_v10, %v1786_v44 }
 0x216   :  { %1030 = vmatmul.f32.gmra.mxu2 %v885_v24  ;;  %vm775_vm15 = vweird.f32 %v1891_v55  ;;  %v842_v2 = vmul.f32 %v841_v40, %v1786_v44  ;;  %v371_v49 = vmul.f32 0.5, %v1532_v22  ;;  %v759_v34 = vmul.f32 %v1844_v37, %v1678_v33 }
 0x217   :  { %v886_v41 = vmul.f32 %v874_v57, %v1756_v9  ;;  %v1095_v1 = vclamps-f32 %v744_v38, 1.0  ;;  %v774_v56 = vadd.f32 %v1140_v50, %v773_v61  ;;  %v797_v47 = vmul.f32 %v1840_v0, %v1724_v17  ;;  %vm777_vm0 = vmor %vm775_vm15, %vm776_vm14 }
 0x218   :  { %v1142_v52 = vpop.eup %1141  ;;  %v782_v10 = vor.u32 1.1754944e-38, %v781_v21  ;;  %vm780_vm1 = vcmp.eq.f32.partialorder %v779_v63, 8.507059e+37  ;;  %v843_v20 = vadd.f32 0.014752088, %v842_v2  ;;  %v832_v54 = vadd.f32 0.0036580483, %v831_v53 }
 0x219   :  { %1056 = vmatmul.f32.gmra.mxu3 %v886_v41  ;;  %v875_v55 = vadd.f32 1.0, %v1095_v1  ;;  %v778_v5 = vsel %vm777_vm0, %v1140_v50, %v774_v56  ;;  %v811_v9 = vmul.f32 %v1142_v52, %v1916_v31  ;;  %v798_v51 = vadd.f32 1.1283791, %v797_v47  ;;  %v1112_v56 = vld [vmem:[%s1980_s6] ss:$0 sm:$0xff]  ;;  %s1307_s6 = smov [#allocation11]  }
 0x21a   :  { %v783_v18 = vsel %vm780_vm1, %v782_v10, %v778_v5  ;;  %v821_v33 = vand.u32 2147483648, %v1916_v31  ;;  %v844_v17 = vmul.f32 %v843_v20, %v1786_v44  ;;  %vm816_vm2 = vweird.f32 %v1142_v52  ;;  %s1070_s28 = sshll.u32 %s1307_s6, 4  ;;  %s1071_s28 = int_to_ptr.vmem [resolvable:$true] %s1070_s28 }
 0x21b   :  { %v887_v23 = vmul.f32 %v875_v55, %v371_v49  ;;  %v784_v22 = vmul.f32 %v783_v18, %v759_v34  ;;  %v812_v32 = vsub.f32 1.0, %v811_v9  ;;  %v819_v30 = vand.u32 2147483647, %v1916_v31 }
 0x21c   :  { %v372_v58 = vmul.f32 0.5, %v1644_v46  ;;  %v845_v16 = vadd.f32 0.112945676, %v844_v17  ;;  %v833_v27 = vmul.f32 %v832_v54, %v1786_v44  ;;  %vm815_vm3 = vweird.f32 %v1916_v31 }
 0x21d   :  { %981 = vmatmul.f32.gmra.mxu0 %v887_v23  ;;  %v1096_v0 = vclamps-f32 %v784_v22, 1.0  ;;  %v813_v37 = vmul.f32 %v1142_v52, %v812_v32  ;;  %vm817_vm4 = vmor %vm815_vm3, %vm816_vm2  ;;  %v822_v15 = vor.u32 1.1754944e-38, %v821_v33  ;;  %v799_v29 = vmul.f32 %v798_v51, %v1691_v7 }
 0x21e   :  { %v846_v42 = vmul.f32 %v845_v16, %v1786_v44  ;;  %vm820_vm5 = vcmp.eq.f32.partialorder %v819_v30, 8.507059e+37  ;;  %v834_v25 = vadd.f32 0.05243302, %v833_v27  ;;  %v373_v31 = vmul.f32 0.5, %v1661_v6 }
 0x21f   :  { %v876_v8 = vadd.f32 1.0, %v1096_v0  ;;  %v814_v59 = vadd.f32 %v1142_v52, %v813_v37 }
 0x220   :  { %v847_v48 = vadd.f32 0.4994258, %v846_v42  ;;  %v835_v19 = vmul.f32 %v834_v25, %v1786_v44 }
 0x221   :  { %v888_v11 = vmul.f32 %v876_v8, %v372_v58  ;;  %v818_v50 = vsel %vm817_vm4, %v1142_v52, %v814_v59 }
 0x222   :  { %v823_v28 = vsel %vm820_vm5, %v822_v15, %v818_v50  ;;  %v848_v45 = vmul.f32 %v847_v48, %v1786_v44  ;;  %v836_v7 = vadd.f32 0.18741608, %v835_v19 }
 0x223   :  { %1007 = vmatmul.f32.gmra.mxu1 %v888_v11  ;;  %v824_v46 = vmul.f32 %v823_v28, %v799_v29 }
 0x224   :  { %v849_v14 = vadd.f32 1.0, %v848_v45  ;;  %v837_v63 = vmul.f32 %v836_v7, %v1786_v44  ;;  %v374_v44 = vmul.f32 0.5, %v1746_v43 }
 0x225   :  { %v1097_v4 = vclamps-f32 %v824_v46, 1.0 }
 0x226   :  { %1143 = vrcp.f32 %v849_v14  ;;  %v861_v60 = vand.u32 2147483648, %v849_v14  ;;  %v838_v39 = vadd.f32 1.1283791, %v837_v63  ;;  %v859_v26 = vand.u32 2147483647, %v849_v14 }
 0x227   :  { %v877_v36 = vadd.f32 1.0, %v1097_v4  ;;  %vm855_vm7 = vweird.f32 %v849_v14 }
 0x228   :  { %v862_v6 = vor.u32 1.1754944e-38, %v861_v60  ;;  %v839_v57 = vmul.f32 %v838_v39, %v1762_v13  ;;  %vm860_vm9 = vcmp.eq.f32.partialorder %v859_v26, 8.507059e+37 }
 0x229   :  { %v889_v62 = vmul.f32 %v877_v36, %v373_v31 }
 0x22b   :  { %1033 = vmatmul.f32.gmra.mxu2 %v889_v62 }
 0x22c   :  { %v1144_v35 = vpop.eup %1143 }
 0x22d   :  { %v851_v12 = vmul.f32 %v1144_v35, %v849_v14  ;;  %vm856_vm6 = vweird.f32 %v1144_v35 }
 0x22e   :  { %vm857_vm8 = vmor %vm855_vm7, %vm856_vm6 }
 0x22f   :  { %v852_v3 = vsub.f32 1.0, %v851_v12 }
 0x231   :  { %v853_v24 = vmul.f32 %v1144_v35, %v852_v3 }
 0x233   :  { %v854_v21 = vadd.f32 %v1144_v35, %v853_v24 }
 0x235   :  { %v858_v38 = vsel %vm857_vm8, %v1144_v35, %v854_v21 }
 0x236   :  { %v863_v61 = vsel %vm860_vm9, %v862_v6, %v858_v38 }
 0x237   :  { %v864_v40 = vmul.f32 %v863_v61, %v839_v57 }
 0x239   :  { %v1098_v53 = vclamps-f32 %v864_v40, 1.0 }
 0x23b   :  { %v878_v41 = vadd.f32 1.0, %v1098_v53 }
 0x23d   :  { %v890_v1 = vmul.f32 %v878_v41, %v374_v44 }
 0x23f   :  { %1059 = vmatmul.f32.gmra.mxu3 %v890_v1 }
 0x261   :  { %v976_v2 = vpop.f32.mrf.mxu0  ;;  %v1002_v49 = vpop.f32.mrf.mxu1 }
 0x262   :  { %v977_v52 = vadd.f32 %v1112_v56, %v976_v2 }
 0x264   :  { %v1003_v34 = vadd.f32 %v1002_v49, %v977_v52 }
 0x269   :  { %v1028_v47 = vpop.f32.mrf.mxu2 }
 0x26a   :  { %v1029_v13 = vadd.f32 %v1028_v47, %v1003_v34 }
 0x26c   :  { %v1054_v10 = vpop.f32.mrf.mxu3 }
 0x26d   :  { %v1055_v55 = vadd.f32 %v1054_v10, %v1029_v13 }
 0x26f   :  { %1063 = vst [vmem:[#allocation11] sm:$0xff] %v1055_v55 }
 0x28f   :  { %v979_v5 = vpop.f32.mrf.mxu0 }
 0x290   :  { %v980_v9 = vadd.f32 %v1112_v56, %v979_v5 }
 0x292   :  { %v1005_v18 = vpop.f32.mrf.mxu1 }
 0x293   :  { %v1006_v43 = vadd.f32 %v1005_v18, %v980_v9 }
 0x299   :  { %v1031_v20 = vpop.f32.mrf.mxu2 }
 0x29a   :  { %v1032_v54 = vadd.f32 %v1031_v20, %v1006_v43  ;;  %v982_v32 = vpop.f32.mrf.mxu0 }
 0x29b   :  { %v983_v51 = vadd.f32 %v1112_v56, %v982_v32 }
 0x29c   :  { %v1057_v23 = vpop.f32.mrf.mxu3 }
 0x29d   :  { %v1058_v22 = vadd.f32 %v1057_v23, %v1032_v54 }
 0x29f   :  { %1064 = vst [vmem:[#allocation11 + $0x8] sm:$0xff] %v1058_v22 }
 0x2a0   :  { %v1008_v33 = vpop.f32.mrf.mxu1 }
 0x2a1   :  { %v1009_v0 = vadd.f32 %v1008_v33, %v983_v51 }
 0x2ae   :  { %v1034_v17 = vpop.f32.mrf.mxu2 }
 0x2af   :  { %v1035_v37 = vadd.f32 %v1034_v17, %v1009_v0 }
 0x2c2   :  { %v1060_v30 = vpop.f32.mrf.mxu3 }
 0x2c3   :  { %v1061_v58 = vadd.f32 %v1060_v30, %v1035_v37 }
 0x2c5   :  { %1065 = vst [vmem:[#allocation11 + $0x10] sm:$0xff] %v1061_v58 }
 0x2c6   :  { %1078 = dma.vmem_to_hbm [thread:$0]  %s1071_s28, 384, %s1073_s8, [#allocation4], %s1300_s18, %s1300_s18, %s1301_s4  }
 0x2c7   :  { %1295 = dma.done.wait [#allocation4], 384  }
 0x2c8   :  { %1296 = vsyncadd [#allocation4], 4294966912 }
 0x2c9   :  { %1083 = vsyncpa [#allocation3], 1 }
 0x2ca   :  { %1084 = vsyncpa [#allocation6], 1 }
 0x2cb   :  { %1085 = vsyncpa [#allocation9], 1 }
 0x2cc   :  { %1086 = vsyncpa [#allocation4], 1 }

</bundles_post_ra>
